<compile_context>
chip_gen: v5e
topology: v5e:2x2
jax: 0.10.0
libtpu: 0.0.40
codegen_flags: <defaults>
</compile_context>

<pallas_src>
import functools

import jax
import jax.numpy as jnp
from jax.experimental import pallas as pl
from jax.experimental.pallas import tpu as pltpu


# ---------------------------------------------------------------------------
# Pallas kernels
# ---------------------------------------------------------------------------

def _conv_relu_pool_kernel(p_ref, w_ref, b_ref, o_ref, *, rows):
    """Fused conv (one matmul) + bias + ReLU + 2x2 maxpool for a batch tile.

    p_ref: (1, 4*rows, kkc) bf16 im2col patches; rows = TB*Mpad, row order
           (quadrant, image-in-tile, pooled-position).
    w_ref: (kkc, Cs) bf16 conv weights (Cs = stored output channels, 8 or 16).
    b_ref: (1, Cs)  f32 bias.
    o_ref: (1, rows, Cs) bf16 pooled output, rows ordered (image, position).
    """
    y = jnp.dot(p_ref[0], w_ref[...], preferred_element_type=jnp.float32)
    m = jnp.maximum(jnp.maximum(y[0 * rows:1 * rows], y[1 * rows:2 * rows]),
                    jnp.maximum(y[2 * rows:3 * rows], y[3 * rows:4 * rows]))
    # max_pool(relu(conv + b)) == relu(max_q(conv_q) + b): bias added once, f32.
    o_ref[0] = jnp.maximum(m + b_ref[...], 0.0).astype(o_ref.dtype)


def _mlp_kernel(x_ref, w1_ref, b1_ref, w2_ref, b2_ref, w3_ref, b3_ref, o_ref):
    """fc1+ReLU -> fc2+ReLU -> fc3 fused; bf16 matmuls, f32 bias/ReLU.

    Stores the full lane-dense (tile_b, 128) padded logits; wrapper slices :10.
    """
    h = jnp.dot(x_ref[...], w1_ref[...], preferred_element_type=jnp.float32)
    h = jnp.maximum(h + b1_ref[...], 0.0)
    h = jnp.dot(h.astype(w2_ref.dtype), w2_ref[...],
                preferred_element_type=jnp.float32)
    h = jnp.maximum(h + b2_ref[...], 0.0)
    y = jnp.dot(h.astype(w3_ref.dtype), w3_ref[...],
                preferred_element_type=jnp.float32)
    o_ref[...] = y + b3_ref[...]


# ---------------------------------------------------------------------------
# Wrappers (pallas_call + cheap XLA glue)
# ---------------------------------------------------------------------------

def _pick_tile(batch, cap, align):
    """Largest divisor of `batch` that is a multiple of `align` and yields at
    least two grid steps (<= min(cap, batch//2)); falls back to the full batch
    (single step; full-dim blocks need no alignment) when none exists."""
    limit = min(cap, batch // 2)
    best = batch
    t = align
    while t <= limit:
        if batch % t == 0:
            best = t
        t += align
    return best


def conv_patches(x_nhwc, K, cin, TB):
    """(B,H,W,>=cin) NHWC -> (B//TB, 4*TB*Mpad, kkc) bf16 pool-quadrant im2col.

    Columns ordered (kh, kw, ci), true width kkc = K*K*cin (no zero pad).
    Rows within a group ordered (quadrant q=2*qh+qw, image-in-tile, m=hp*Wp+wp);
    pooled row m maps to conv output position (2*hp+qh, 2*wp+qw).  Pooled
    position count is padded to Mpad (multiple of 16) with zero rows.
    """
    B, H, W, _ = x_nhwc.shape
    Ho, Wo = H - K + 1, W - K + 1
    assert Ho % 2 == 0 and Wo % 2 == 0, "geometry must give even conv output"
    Hp, Wp = Ho // 2, Wo // 2
    M = Hp * Wp
    Mpad = -(-M // 16) * 16
    kkc = K * K * cin
    x = x_nhwc[..., :cin].astype(jnp.bfloat16)
    cols = jnp.concatenate([x[:, :, kw:kw + Wo, :] for kw in range(K)], axis=-1)
    pat = jnp.concatenate([cols[:, kh:kh + Ho, :, :] for kh in range(K)], axis=-1)
    pat = pat.reshape(B, Hp, 2, Wp, 2, kkc).transpose(0, 2, 4, 1, 3, 5)
    pat = pat.reshape(B, 4, M, kkc)
    if Mpad > M:
        pat = jnp.pad(pat, ((0, 0), (0, 0), (0, Mpad - M), (0, 0)))
    G = B // TB
    pat = pat.reshape(G, TB, 4, Mpad, kkc).transpose(0, 2, 1, 3, 4)
    return pat.reshape(G, 4 * TB * Mpad, kkc), Hp, Wp, Mpad


def conv_relu_pool(x_nhwc, w_mat, b_row, *, K, cin):
    """Fused conv(valid, stride 1) + bias + ReLU + 2x2 maxpool, NHWC in/out."""
    B = x_nhwc.shape[0]
    kkc, c_store = w_mat.shape
    assert kkc == K * K * cin
    TB = _pick_tile(B, cap=16, align=1)          # images per grid step
    G = B // TB
    pat, Hp, Wp, Mpad = conv_patches(x_nhwc, K, cin, TB)
    rows = TB * Mpad
    out = pl.pallas_call(
        functools.partial(_conv_relu_pool_kernel, rows=rows),
        out_shape=jax.ShapeDtypeStruct((G, rows, c_store), jnp.bfloat16),
        grid_spec=pltpu.PrefetchScalarGridSpec(
            num_scalar_prefetch=0,
            grid=(G,),
            in_specs=[
                pl.BlockSpec((1, 4 * rows, kkc), lambda g: (g, 0, 0)),
                pl.BlockSpec((kkc, c_store), lambda g: (0, 0)),
                pl.BlockSpec((1, c_store), lambda g: (0, 0)),
            ],
            out_specs=pl.BlockSpec((1, rows, c_store), lambda g: (g, 0, 0)),
        ),
        compiler_params=pltpu.CompilerParams(
            dimension_semantics=("parallel",)),
    )(pat, w_mat, b_row)
    M = Hp * Wp
    out = out.reshape(B, Mpad, c_store)[:, :M, :]
    return out.reshape(B, Hp, Wp, c_store)


def mlp(x, w1, b1, w2, b2, w3, b3, *, n_out=10):
    """Fused fc1(+ReLU) -> fc2(+ReLU) -> fc3 over batch tiles."""
    B, Kin = x.shape
    NP = w1.shape[1]                       # 128 (padded hidden / logit width)
    tile_b = _pick_tile(B, cap=128, align=16)
    full = lambda i: (0, 0)
    out = pl.pallas_call(
        _mlp_kernel,
        out_shape=jax.ShapeDtypeStruct((B, NP), jnp.float32),
        grid_spec=pltpu.PrefetchScalarGridSpec(
            num_scalar_prefetch=0,
            grid=(B // tile_b,),
            in_specs=[
                pl.BlockSpec((tile_b, Kin), lambda i: (i, 0)),
                pl.BlockSpec((Kin, NP), full),
                pl.BlockSpec((1, NP), full),
                pl.BlockSpec((NP, NP), full),
                pl.BlockSpec((1, NP), full),
                pl.BlockSpec((NP, NP), full),
                pl.BlockSpec((1, NP), full),
            ],
            out_specs=pl.BlockSpec((tile_b, NP), lambda i: (i, 0)),
        ),
        compiler_params=pltpu.CompilerParams(
            dimension_semantics=("parallel",)),
    )(x, w1, b1, w2, b2, w3, b3)
    return out[:, :n_out]                  # lane-dense store; slice in XLA


def net_forward(x_nchw, pp):
    x = jnp.transpose(x_nchw, (0, 2, 3, 1))                        # NHWC once
    a1 = conv_relu_pool(x, pp["c1_w"], pp["c1_b"], K=5, cin=3)     # (B,14,14,8)
    a2 = conv_relu_pool(a1, pp["c2_w"], pp["c2_b"], K=5, cin=6)    # (B,5,5,16)
    B = a2.shape[0]
    xf = a2.reshape(B, 5 * 5 * 16)           # free reshape; feature order (h,w,c)
    return mlp(xf, pp["fc1_w"], pp["fc1_b"], pp["fc2_w"], pp["fc2_b"],
               pp["fc3_w"], pp["fc3_b"], n_out=10)                 # (B, 10)


# ---------------------------------------------------------------------------
# Parameters: torch-layout init + one-time packing into kernel layouts
# ---------------------------------------------------------------------------

def init_params(key):
    """Torch-layout params with PyTorch default U(-1/sqrt(fan_in), ...) init."""
    def uniform(k, shape, fan_in):
        bound = 1.0 / jnp.sqrt(jnp.float32(fan_in))
        return jax.random.uniform(k, shape, jnp.float32, -bound, bound)

    ks = jax.random.split(key, 10)
    return {
        "conv1_w": uniform(ks[0], (6, 3, 5, 5), 75),
        "conv1_b": uniform(ks[1], (6,), 75),
        "conv2_w": uniform(ks[2], (16, 6, 5, 5), 150),
        "conv2_b": uniform(ks[3], (16,), 150),
        "fc1_w": uniform(ks[4], (120, 400), 400),   # torch (out, in)
        "fc1_b": uniform(ks[5], (120,), 400),
        "fc2_w": uniform(ks[6], (84, 120), 120),
        "fc2_b": uniform(ks[7], (84,), 120),
        "fc3_w": uniform(ks[8], (10, 84), 84),
        "fc3_b": uniform(ks[9], (10,), 84),
    }


def pack_params(p):
    """One-time repack: (kh,kw,ci)-ordered bf16 conv matrices at true K with
    output channels padded only to the stored width (8 / 16); fc weights in
    bf16, permuted so the NHWC (h,w,c) flatten matches torch's NCHW view,
    padded to 128 lanes with zero rows/cols (padding stays zero through ReLU)."""
    def conv_pack(w, b, c_store):
        cout, cin, K, _ = w.shape
        m = jnp.transpose(w, (2, 3, 1, 0)).reshape(K * K * cin, cout)
        m = jnp.pad(m, ((0, 0), (0, c_store - cout))).astype(jnp.bfloat16)
        bb = jnp.pad(b, (0, c_store - cout)).reshape(1, c_store)
        return m, bb.astype(jnp.float32)

    c1_w, c1_b = conv_pack(p["conv1_w"], p["conv1_b"], 8)
    c2_w, c2_b = conv_pack(p["conv2_w"], p["conv2_b"], 16)

    # fc1: torch rows see features ordered (c, h, w); our activation flatten is
    # (h, w, c) of the (B, 5, 5, 16) NHWC conv2 output -> permute weight rows.
    w1 = p["fc1_w"].reshape(120, 16, 5, 5).transpose(2, 3, 1, 0).reshape(400, 120)
    w1 = jnp.pad(w1, ((0, 0), (0, 128 - 120))).astype(jnp.bfloat16)
    b1 = jnp.pad(p["fc1_b"], (0, 128 - 120)).reshape(1, 128)

    w2 = jnp.pad(p["fc2_w"].T, ((0, 128 - 120), (0, 128 - 84))).astype(jnp.bfloat16)
    b2 = jnp.pad(p["fc2_b"], (0, 128 - 84)).reshape(1, 128)
    w3 = jnp.pad(p["fc3_w"].T, ((0, 128 - 84), (0, 128 - 10))).astype(jnp.bfloat16)
    b3 = jnp.pad(p["fc3_b"], (0, 128 - 10)).reshape(1, 128)

    return {"c1_w": c1_w, "c1_b": c1_b, "c2_w": c2_w, "c2_b": c2_b,
            "fc1_w": w1, "fc1_b": b1, "fc2_w": w2, "fc2_b": b2,
            "fc3_w": w3, "fc3_b": b3}


if __name__ == "__main__":
    key = jax.random.PRNGKey(0)
    k_x, k_p = jax.random.split(key)
    # LeNet geometry needs 32x32 spatial input so the flatten is 16*5*5 = 400.
    x = jax.random.normal(k_x, (2, 3, 32, 32), dtype=jnp.float32)
    packed = pack_params(init_params(k_p))

    out = jax.jit(net_forward)(x, packed)
    out = jax.block_until_ready(out)
    assert out.shape == (2, 10) and out.dtype == jnp.float32
    assert bool(jnp.all(jnp.isfinite(out)))
    print("KERNEL_OK")
</pallas_src>

<mosaic_0001>
module attributes {stable_mosaic.version = 11 : i64} {
  func.func @_conv_relu_pool_kernel(%arg0: i32, %arg1: memref<1x832x75xbf16, #tpu.memory_space<vmem>>, %arg2: memref<75x8xbf16, #tpu.memory_space<vmem>>, %arg3: memref<1x8xf32, #tpu.memory_space<vmem>>, %arg4: memref<1x208x8xbf16, #tpu.memory_space<vmem>>) attributes {dimension_semantics = [#tpu.dimension_semantics<parallel>], iteration_bounds = array<i64: 2>, scalar_prefetch = 0 : i64, scratch_operands = 0 : i64, tpu.core_type = #tpu.core_type<tc>, window_params = [{transform_indices = @transform_0, window_bounds = array<i64: 1, 832, 75>}, {pipeline_mode = #tpu.pipeline_mode<synchronous>, transform_indices = @transform_1, window_bounds = array<i64: 75, 8>}, {pipeline_mode = #tpu.pipeline_mode<synchronous>, transform_indices = @transform_2, window_bounds = array<i64: 1, 8>}, {transform_indices = @transform_3, window_bounds = array<i64: 1, 208, 8>}]} {
    %c0 = arith.constant 0 : index
    %c0_0 = arith.constant 0 : index
    %c0_1 = arith.constant 0 : index
    %0 = vector.load %arg1[%c0, %c0_0, %c0_1] : memref<1x832x75xbf16, #tpu.memory_space<vmem>>, vector<1x832x75xbf16>
    %1 = vector.shape_cast %0 : vector<1x832x75xbf16> to vector<832x75xbf16>
    %c0_2 = arith.constant 0 : index
    %c0_3 = arith.constant 0 : index
    %2 = vector.load %arg2[%c0_2, %c0_3] : memref<75x8xbf16, #tpu.memory_space<vmem>>, vector<75x8xbf16>
    %cst = arith.constant dense<0.000000e+00> : vector<832x8xf32>
    %3 = tpu.matmul %1, %2, %cst {dimension_numbers = #tpu.dot_dimension_numbers<[1], [0], [0], [1], [0, 0, 1, 1], [], []>} : vector<832x75xbf16>, vector<75x8xbf16>, vector<832x8xf32> -> vector<832x8xf32>
    %4 = vector.extract_strided_slice %3 {offsets = [0, 0], sizes = [208, 8], strides = [1, 1]} : vector<832x8xf32> to vector<208x8xf32>
    %5 = vector.extract_strided_slice %3 {offsets = [208, 0], sizes = [208, 8], strides = [1, 1]} : vector<832x8xf32> to vector<208x8xf32>
    %6 = arith.maximumf %4, %5 : vector<208x8xf32>
    %7 = vector.extract_strided_slice %3 {offsets = [416, 0], sizes = [208, 8], strides = [1, 1]} : vector<832x8xf32> to vector<208x8xf32>
    %8 = vector.extract_strided_slice %3 {offsets = [624, 0], sizes = [208, 8], strides = [1, 1]} : vector<832x8xf32> to vector<208x8xf32>
    %9 = arith.maximumf %7, %8 : vector<208x8xf32>
    %10 = arith.maximumf %6, %9 : vector<208x8xf32>
    %c0_4 = arith.constant 0 : index
    %c0_5 = arith.constant 0 : index
    %11 = vector.load %arg3[%c0_4, %c0_5] : memref<1x8xf32, #tpu.memory_space<vmem>>, vector<1x8xf32>
    %12 = vector.broadcast %11 : vector<1x8xf32> to vector<208x8xf32>
    %13 = arith.addf %10, %12 : vector<208x8xf32>
    %cst_6 = arith.constant 0.000000e+00 : f32
    %14 = vector.broadcast %cst_6 : f32 to vector<208x8xf32>
    %15 = arith.maximumf %13, %14 : vector<208x8xf32>
    %16 = arith.truncf %15 : vector<208x8xf32> to vector<208x8xbf16>
    %c0_7 = arith.constant 0 : index
    %c0_8 = arith.constant 0 : index
    %c0_9 = arith.constant 0 : index
    %17 = vector.load %arg4[%c0_7, %c0_8, %c0_9] : memref<1x208x8xbf16, #tpu.memory_space<vmem>>, vector<1x208x8xbf16>
    %18 = vector.shape_cast %17 : vector<1x208x8xbf16> to vector<208x8xbf16>
    %19 = vector.shape_cast %16 : vector<208x8xbf16> to vector<1x208x8xbf16>
    tpu.vector_store %arg4[%c0_7, %c0_8, %c0_9], %19 {strides = array<i32>} : memref<1x208x8xbf16, #tpu.memory_space<vmem>>, vector<1x208x8xbf16>,
    return
  }
  func.func @transform_0(%arg0: i32) -> (i32, i32, i32) {
    %c0_i32 = arith.constant 0 : i32
    %c0_i32_0 = arith.constant 0 : i32
    %c0_i32_1 = arith.constant 0 : i32
    return %arg0, %c0_i32, %c0_i32_0 : i32, i32, i32
  }
  func.func @transform_1(%arg0: i32) -> (i32, i32) {
    %c0_i32 = arith.constant 0 : i32
    %c0_i32_0 = arith.constant 0 : i32
    %c0_i32_1 = arith.constant 0 : i32
    return %c0_i32, %c0_i32_0 : i32, i32
  }
  func.func @transform_2(%arg0: i32) -> (i32, i32) {
    %c0_i32 = arith.constant 0 : i32
    %c0_i32_0 = arith.constant 0 : i32
    %c0_i32_1 = arith.constant 0 : i32
    return %c0_i32, %c0_i32_0 : i32, i32
  }
  func.func @transform_3(%arg0: i32) -> (i32, i32, i32) {
    %c0_i32 = arith.constant 0 : i32
    %c0_i32_0 = arith.constant 0 : i32
    %c0_i32_1 = arith.constant 0 : i32
    return %arg0, %c0_i32, %c0_i32_0 : i32, i32, i32
  }
}

module attributes {stable_mosaic.version = 11 : i64} {
  func.func @_mlp_kernel(%arg0: i32, %arg1: memref<2x400xbf16, #tpu.memory_space<vmem>>, %arg2: memref<400x128xbf16, #tpu.memory_space<vmem>>, %arg3: memref<1x128xf32, #tpu.memory_space<vmem>>, %arg4: memref<128x128xbf16, #tpu.memory_space<vmem>>, %arg5: memref<1x128xf32, #tpu.memory_space<vmem>>, %arg6: memref<128x128xbf16, #tpu.memory_space<vmem>>, %arg7: memref<1x128xf32, #tpu.memory_space<vmem>>, %arg8: memref<2x128xf32, #tpu.memory_space<vmem>>) attributes {dimension_semantics = [#tpu.dimension_semantics<parallel>], iteration_bounds = array<i64: 1>, scalar_prefetch = 0 : i64, scratch_operands = 0 : i64, tpu.core_type = #tpu.core_type<tc>, window_params = [{transform_indices = @transform_0, window_bounds = array<i64: 2, 400>}, {pipeline_mode = #tpu.pipeline_mode<synchronous>, transform_indices = @transform_1, window_bounds = array<i64: 400, 128>}, {pipeline_mode = #tpu.pipeline_mode<synchronous>, transform_indices = @transform_2, window_bounds = array<i64: 1, 128>}, {pipeline_mode = #tpu.pipeline_mode<synchronous>, transform_indices = @transform_3, window_bounds = array<i64: 128, 128>}, {pipeline_mode = #tpu.pipeline_mode<synchronous>, transform_indices = @transform_4, window_bounds = array<i64: 1, 128>}, {pipeline_mode = #tpu.pipeline_mode<synchronous>, transform_indices = @transform_5, window_bounds = array<i64: 128, 128>}, {pipeline_mode = #tpu.pipeline_mode<synchronous>, transform_indices = @transform_6, window_bounds = array<i64: 1, 128>}, {transform_indices = @transform_7, window_bounds = array<i64: 2, 128>}]} {
    %c0 = arith.constant 0 : index
    %c0_0 = arith.constant 0 : index
    %0 = vector.load %arg1[%c0, %c0_0] : memref<2x400xbf16, #tpu.memory_space<vmem>>, vector<2x400xbf16>
    %c0_1 = arith.constant 0 : index
    %c0_2 = arith.constant 0 : index
    %1 = vector.load %arg2[%c0_1, %c0_2] : memref<400x128xbf16, #tpu.memory_space<vmem>>, vector<400x128xbf16>
    %cst = arith.constant dense<0.000000e+00> : vector<2x128xf32>
    %2 = tpu.matmul %0, %1, %cst {dimension_numbers = #tpu.dot_dimension_numbers<[1], [0], [0], [1], [0, 0, 1, 1], [], []>} : vector<2x400xbf16>, vector<400x128xbf16>, vector<2x128xf32> -> vector<2x128xf32>
    %c0_3 = arith.constant 0 : index
    %c0_4 = arith.constant 0 : index
    %3 = vector.load %arg3[%c0_3, %c0_4] : memref<1x128xf32, #tpu.memory_space<vmem>>, vector<1x128xf32>
    %4 = vector.broadcast %3 : vector<1x128xf32> to vector<2x128xf32>
    %5 = arith.addf %2, %4 : vector<2x128xf32>
    %cst_5 = arith.constant 0.000000e+00 : f32
    %6 = vector.broadcast %cst_5 : f32 to vector<2x128xf32>
    %7 = arith.maximumf %5, %6 : vector<2x128xf32>
    %8 = arith.truncf %7 : vector<2x128xf32> to vector<2x128xbf16>
    %c0_6 = arith.constant 0 : index
    %c0_7 = arith.constant 0 : index
    %9 = vector.load %arg4[%c0_6, %c0_7] : memref<128x128xbf16, #tpu.memory_space<vmem>>, vector<128x128xbf16>
    %cst_8 = arith.constant dense<0.000000e+00> : vector<2x128xf32>
    %10 = tpu.matmul %8, %9, %cst_8 {dimension_numbers = #tpu.dot_dimension_numbers<[1], [0], [0], [1], [0, 0, 1, 1], [], []>} : vector<2x128xbf16>, vector<128x128xbf16>, vector<2x128xf32> -> vector<2x128xf32>
    %c0_9 = arith.constant 0 : index
    %c0_10 = arith.constant 0 : index
    %11 = vector.load %arg5[%c0_9, %c0_10] : memref<1x128xf32, #tpu.memory_space<vmem>>, vector<1x128xf32>
    %12 = vector.broadcast %11 : vector<1x128xf32> to vector<2x128xf32>
    %13 = arith.addf %10, %12 : vector<2x128xf32>
    %cst_11 = arith.constant 0.000000e+00 : f32
    %14 = vector.broadcast %cst_11 : f32 to vector<2x128xf32>
    %15 = arith.maximumf %13, %14 : vector<2x128xf32>
    %16 = arith.truncf %15 : vector<2x128xf32> to vector<2x128xbf16>
    %c0_12 = arith.constant 0 : index
    %c0_13 = arith.constant 0 : index
    %17 = vector.load %arg6[%c0_12, %c0_13] : memref<128x128xbf16, #tpu.memory_space<vmem>>, vector<128x128xbf16>
    %cst_14 = arith.constant dense<0.000000e+00> : vector<2x128xf32>
    %18 = tpu.matmul %16, %17, %cst_14 {dimension_numbers = #tpu.dot_dimension_numbers<[1], [0], [0], [1], [0, 0, 1, 1], [], []>} : vector<2x128xbf16>, vector<128x128xbf16>, vector<2x128xf32> -> vector<2x128xf32>
    %c0_15 = arith.constant 0 : index
    %c0_16 = arith.constant 0 : index
    %19 = vector.load %arg7[%c0_15, %c0_16] : memref<1x128xf32, #tpu.memory_space<vmem>>, vector<1x128xf32>
    %20 = vector.broadcast %19 : vector<1x128xf32> to vector<2x128xf32>
    %21 = arith.addf %18, %20 : vector<2x128xf32>
    %c0_17 = arith.constant 0 : index
    %c0_18 = arith.constant 0 : index
    %22 = vector.load %arg8[%c0_17, %c0_18] : memref<2x128xf32, #tpu.memory_space<vmem>>, vector<2x128xf32>
    tpu.vector_store %arg8[%c0_17, %c0_18], %21 {strides = array<i32>} : memref<2x128xf32, #tpu.memory_space<vmem>>, vector<2x128xf32>,
    return
  }
  func.func @transform_0(%arg0: i32) -> (i32, i32) {
    %c0_i32 = arith.constant 0 : i32
    %c0_i32_0 = arith.constant 0 : i32
    return %arg0, %c0_i32 : i32, i32
  }
  func.func @transform_1(%arg0: i32) -> (i32, i32) {
    %c0_i32 = arith.constant 0 : i32
    %c0_i32_0 = arith.constant 0 : i32
    %c0_i32_1 = arith.constant 0 : i32
    return %c0_i32, %c0_i32_0 : i32, i32
  }
  func.func @transform_2(%arg0: i32) -> (i32, i32) {
    %c0_i32 = arith.constant 0 : i32
    %c0_i32_0 = arith.constant 0 : i32
    %c0_i32_1 = arith.constant 0 : i32
    return %c0_i32, %c0_i32_0 : i32, i32
  }
  func.func @transform_3(%arg0: i32) -> (i32, i32) {
    %c0_i32 = arith.constant 0 : i32
    %c0_i32_0 = arith.constant 0 : i32
    %c0_i32_1 = arith.constant 0 : i32
    return %c0_i32, %c0_i32_0 : i32, i32
  }
  func.func @transform_4(%arg0: i32) -> (i32, i32) {
    %c0_i32 = arith.constant 0 : i32
    %c0_i32_0 = arith.constant 0 : i32
    %c0_i32_1 = arith.constant 0 : i32
    return %c0_i32, %c0_i32_0 : i32, i32
  }
  func.func @transform_5(%arg0: i32) -> (i32, i32) {
    %c0_i32 = arith.constant 0 : i32
    %c0_i32_0 = arith.constant 0 : i32
    %c0_i32_1 = arith.constant 0 : i32
    return %c0_i32, %c0_i32_0 : i32, i32
  }
  func.func @transform_6(%arg0: i32) -> (i32, i32) {
    %c0_i32 = arith.constant 0 : i32
    %c0_i32_0 = arith.constant 0 : i32
    %c0_i32_1 = arith.constant 0 : i32
    return %c0_i32, %c0_i32_0 : i32, i32
  }
  func.func @transform_7(%arg0: i32) -> (i32, i32) {
    %c0_i32 = arith.constant 0 : i32
    %c0_i32_0 = arith.constant 0 : i32
    return %arg0, %c0_i32 : i32, i32
  }
}

module attributes {stable_mosaic.version = 11 : i64} {
  func.func @_conv_relu_pool_kernel(%arg0: i32, %arg1: memref<1x128x150xbf16, #tpu.memory_space<vmem>>, %arg2: memref<150x16xbf16, #tpu.memory_space<vmem>>, %arg3: memref<1x16xf32, #tpu.memory_space<vmem>>, %arg4: memref<1x32x16xbf16, #tpu.memory_space<vmem>>) attributes {dimension_semantics = [#tpu.dimension_semantics<parallel>], iteration_bounds = array<i64: 2>, scalar_prefetch = 0 : i64, scratch_operands = 0 : i64, tpu.core_type = #tpu.core_type<tc>, window_params = [{transform_indices = @transform_0, window_bounds = array<i64: 1, 128, 150>}, {pipeline_mode = #tpu.pipeline_mode<synchronous>, transform_indices = @transform_1, window_bounds = array<i64: 150, 16>}, {pipeline_mode = #tpu.pipeline_mode<synchronous>, transform_indices = @transform_2, window_bounds = array<i64: 1, 16>}, {transform_indices = @transform_3, window_bounds = array<i64: 1, 32, 16>}]} {
    %c0 = arith.constant 0 : index
    %c0_0 = arith.constant 0 : index
    %c0_1 = arith.constant 0 : index
    %0 = vector.load %arg1[%c0, %c0_0, %c0_1] : memref<1x128x150xbf16, #tpu.memory_space<vmem>>, vector<1x128x150xbf16>
    %1 = vector.shape_cast %0 : vector<1x128x150xbf16> to vector<128x150xbf16>
    %c0_2 = arith.constant 0 : index
    %c0_3 = arith.constant 0 : index
    %2 = vector.load %arg2[%c0_2, %c0_3] : memref<150x16xbf16, #tpu.memory_space<vmem>>, vector<150x16xbf16>
    %cst = arith.constant dense<0.000000e+00> : vector<128x16xf32>
    %3 = tpu.matmul %1, %2, %cst {dimension_numbers = #tpu.dot_dimension_numbers<[1], [0], [0], [1], [0, 0, 1, 1], [], []>} : vector<128x150xbf16>, vector<150x16xbf16>, vector<128x16xf32> -> vector<128x16xf32>
    %4 = vector.extract_strided_slice %3 {offsets = [0, 0], sizes = [32, 16], strides = [1, 1]} : vector<128x16xf32> to vector<32x16xf32>
    %5 = vector.extract_strided_slice %3 {offsets = [32, 0], sizes = [32, 16], strides = [1, 1]} : vector<128x16xf32> to vector<32x16xf32>
    %6 = arith.maximumf %4, %5 : vector<32x16xf32>
    %7 = vector.extract_strided_slice %3 {offsets = [64, 0], sizes = [32, 16], strides = [1, 1]} : vector<128x16xf32> to vector<32x16xf32>
    %8 = vector.extract_strided_slice %3 {offsets = [96, 0], sizes = [32, 16], strides = [1, 1]} : vector<128x16xf32> to vector<32x16xf32>
    %9 = arith.maximumf %7, %8 : vector<32x16xf32>
    %10 = arith.maximumf %6, %9 : vector<32x16xf32>
    %c0_4 = arith.constant 0 : index
    %c0_5 = arith.constant 0 : index
    %11 = vector.load %arg3[%c0_4, %c0_5] : memref<1x16xf32, #tpu.memory_space<vmem>>, vector<1x16xf32>
    %12 = vector.broadcast %11 : vector<1x16xf32> to vector<32x16xf32>
    %13 = arith.addf %10, %12 : vector<32x16xf32>
    %cst_6 = arith.constant 0.000000e+00 : f32
    %14 = vector.broadcast %cst_6 : f32 to vector<32x16xf32>
    %15 = arith.maximumf %13, %14 : vector<32x16xf32>
    %16 = arith.truncf %15 : vector<32x16xf32> to vector<32x16xbf16>
    %c0_7 = arith.constant 0 : index
    %c0_8 = arith.constant 0 : index
    %c0_9 = arith.constant 0 : index
    %17 = vector.load %arg4[%c0_7, %c0_8, %c0_9] : memref<1x32x16xbf16, #tpu.memory_space<vmem>>, vector<1x32x16xbf16>
    %18 = vector.shape_cast %17 : vector<1x32x16xbf16> to vector<32x16xbf16>
    %19 = vector.shape_cast %16 : vector<32x16xbf16> to vector<1x32x16xbf16>
    tpu.vector_store %arg4[%c0_7, %c0_8, %c0_9], %19 {strides = array<i32>} : memref<1x32x16xbf16, #tpu.memory_space<vmem>>, vector<1x32x16xbf16>,
    return
  }
  func.func @transform_0(%arg0: i32) -> (i32, i32, i32) {
    %c0_i32 = arith.constant 0 : i32
    %c0_i32_0 = arith.constant 0 : i32
    %c0_i32_1 = arith.constant 0 : i32
    return %arg0, %c0_i32, %c0_i32_0 : i32, i32, i32
  }
  func.func @transform_1(%arg0: i32) -> (i32, i32) {
    %c0_i32 = arith.constant 0 : i32
    %c0_i32_0 = arith.constant 0 : i32
    %c0_i32_1 = arith.constant 0 : i32
    return %c0_i32, %c0_i32_0 : i32, i32
  }
  func.func @transform_2(%arg0: i32) -> (i32, i32) {
    %c0_i32 = arith.constant 0 : i32
    %c0_i32_0 = arith.constant 0 : i32
    %c0_i32_1 = arith.constant 0 : i32
    return %c0_i32, %c0_i32_0 : i32, i32
  }
  func.func @transform_3(%arg0: i32) -> (i32, i32, i32) {
    %c0_i32 = arith.constant 0 : i32
    %c0_i32_0 = arith.constant 0 : i32
    %c0_i32_1 = arith.constant 0 : i32
    return %arg0, %c0_i32, %c0_i32_0 : i32, i32, i32
  }
}

</mosaic_0001>

<bundles_post_ra>
// kernel: net_forward.3
= control target key start
LH: loop header
LB: loop body
LE: loop exit
PB: predicated region body
PF: predicated region fallthrough
CT: control target
= control target key end

     0   :  { %s1652_s12 = smov 0   ;;  %s1882_s0 = inlined_call_operand.vmem [shape: bf16[2,832,75], index: 0, kind: input, shape index: {}]   ;;  %s1883_s1 = inlined_call_operand.vmem [shape: bf16[75,8], index: 1, kind: input, shape index: {}]   ;;  %s1884_s2 = inlined_call_operand.vmem [shape: f32[1,8], index: 2, kind: input, shape index: {}]   ;;  %s1885_s3 = inlined_call_operand.vmem [shape: bf16[2,208,8], index: 3, kind: output, shape index: {}]  }
   0x1 LB: > { %s1250_s13 = sadd.s32 4294967295, %s1629_s12   ;;  %p1254_p0 = scmp.ge.s32.totalorder %s1629_s12, 1  ;;  %s1629_s12 = sphi %s1652_s12, %s13_s12  }
   0x2   : > { %p137_p1 = scmp.lt.s32.totalorder %s1629_s12, 3 }
   0x4   : > { %p138_p2 = pnand %p1254_p0, %p137_p1 }
   0x5   : > { %p161_p3 = scmp.lt.s32.totalorder (!%p138_p2), %s1250_s13, 1 }
   0x6   : > { %141 = sbr.rel (%p138_p2) target bundleno = 380 (0x17c), region = 32 }
   0xb   : > { %v1483_v0 = vld [vmem:[%s1883_s1 + $0x20] sm:$0xf]  ;;  %v1595_v1 = vld [vmem:[%s1883_s1 + $0x20] sm:$0x30]  ;;  %vm732_vm0 = vcmask 1044480   ;;  %vm733_vm1 = vcmask 1045504  }
   0xc   : > { %v1484_v2 = vor.u32 %v1595_v1, %v1483_v0  ;;  %v1631_v3 = vmov 65535   ;;  %v1594_v7 = vld [vmem:[%s1883_s1 + $0x18] sm:$0xff]  ;;  %v1593_v8 = vld [vmem:[%s1883_s1 + $0x10] sm:$0xff]  ;;  %s1887_s13 = smov (!%p161_p3, %s1250_s13), 1  ;;  %v1592_v9 = vld [vmem:[%s1883_s1 + $0x8] sm:$0xff]  ;;  %vm575_vm2 = vcmask 613376  }
   0xd   : > { %v734_v4 = vsel %vm732_vm0, 4294967295, %v1631_v3  ;;  %s1611_s24 = smul.u32 416, %s1887_s13  ;;  %v1591_v10 = vld [vmem:[%s1883_s1] sm:$0xff]  ;;  %vm1168_vm3 = vcmask 60416  }
   0xe   : > { %v735_v5 = vsel %vm733_vm1, %v734_v4, 0  ;;  %v1761_v53 = vld [vmem:[%s1884_s2] ss:$0 sm:$0xff]  ;;  %s1612_s5 = smul.u32 104, %s1887_s13 }
   0xf   : > { %v737_v6 = vand.u32 %v1484_v2, %v735_v5  ;;  %s1684_s29 = scalar_lea.vmem %s1882_s0, %s1611_s24 }
  0x10   : > { %v1539_v11 = vld [vmem:[%s1684_s29] sm:$0xff]  ;;  %v1552_v12 = vld [vmem:[%s1684_s29 + $0x68] sm:$0xff]  ;;  %v1565_v13 = vld [vmem:[%s1684_s29 + $0xd0] sm:$0xff]  ;;  %s1768_s8 = scalar_lea.vmem %s1885_s3, %s1612_s5 }
  0x11   : > { %742 = vmatpush.bf16.msra.mxu0 %v737_v6  ;;  %1596 = vmatpush.bf16.msra.mxu1 %v737_v6  ;;  %v1578_v14 = vld [vmem:[%s1684_s29 + $0x138] sm:$0xff]  ;;  %v1540_v15 = vld [vmem:[%s1684_s29 + $0x8] sm:$0xff]  ;;  %v1553_v16 = vld [vmem:[%s1684_s29 + $0x70] sm:$0xff] }
  0x12   : > { %1597 = vmatpush.bf16.msra.mxu2 %v737_v6  ;;  %1598 = vmatpush.bf16.msra.mxu3 %v737_v6  ;;  %v1566_v17 = vld [vmem:[%s1684_s29 + $0xd8] sm:$0xff]  ;;  %v1579_v18 = vld [vmem:[%s1684_s29 + $0x140] sm:$0xff]  ;;  %v1541_v19 = vld [vmem:[%s1684_s29 + $0x10] sm:$0xff] }
  0x13   : > { %v1554_v20 = vld [vmem:[%s1684_s29 + $0x78] sm:$0xff]  ;;  %v1567_v21 = vld [vmem:[%s1684_s29 + $0xe0] sm:$0xff]  ;;  %v1580_v22 = vld [vmem:[%s1684_s29 + $0x148] sm:$0xff] }
  0x14   : > { %v1542_v23 = vld [vmem:[%s1684_s29 + $0x18] sm:$0xff]  ;;  %v1555_v24 = vld [vmem:[%s1684_s29 + $0x80] sm:$0xff]  ;;  %v1568_v25 = vld [vmem:[%s1684_s29 + $0xe8] sm:$0xff] }
  0x15   : > { %743 = vmatpush.bf16.msra.mxu0 %v1594_v7  ;;  %1599 = vmatpush.bf16.msra.mxu1 %v1594_v7  ;;  %v1581_v26 = vld [vmem:[%s1684_s29 + $0x150] sm:$0xff]  ;;  %v1543_v27 = vld [vmem:[%s1684_s29 + $0x20] sm:$0xff]  ;;  %v1556_v28 = vld [vmem:[%s1684_s29 + $0x88] sm:$0xff] }
  0x16   : > { %1600 = vmatpush.bf16.msra.mxu2 %v1594_v7  ;;  %1601 = vmatpush.bf16.msra.mxu3 %v1594_v7  ;;  %v1569_v29 = vld [vmem:[%s1684_s29 + $0xf0] sm:$0xff]  ;;  %v1582_v30 = vld [vmem:[%s1684_s29 + $0x158] sm:$0xff]  ;;  %v1544_v31 = vld [vmem:[%s1684_s29 + $0x28] sm:$0xff] }
  0x17   : > { %v1557_v32 = vld [vmem:[%s1684_s29 + $0x90] sm:$0xff]  ;;  %v1570_v33 = vld [vmem:[%s1684_s29 + $0xf8] sm:$0xff]  ;;  %v1583_v34 = vld [vmem:[%s1684_s29 + $0x160] sm:$0xff] }
  0x18   : > { %v1545_v35 = vld [vmem:[%s1684_s29 + $0x30] sm:$0xff]  ;;  %v1558_v36 = vld [vmem:[%s1684_s29 + $0x98] sm:$0xff]  ;;  %v1571_v37 = vld [vmem:[%s1684_s29 + $0x100] sm:$0xff] }
  0x19   : > { %744 = vmatpush.bf16.msra.mxu0 %v1593_v8  ;;  %1602 = vmatpush.bf16.msra.mxu1 %v1593_v8  ;;  %v1584_v38 = vld [vmem:[%s1684_s29 + $0x168] sm:$0xff]  ;;  %v1546_v39 = vld [vmem:[%s1684_s29 + $0x38] sm:$0xff]  ;;  %v1559_v40 = vld [vmem:[%s1684_s29 + $0xa0] sm:$0xff] }
  0x1a   : > { %1603 = vmatpush.bf16.msra.mxu2 %v1593_v8  ;;  %1604 = vmatpush.bf16.msra.mxu3 %v1593_v8  ;;  %v1572_v41 = vld [vmem:[%s1684_s29 + $0x108] sm:$0xff]  ;;  %v1585_v42 = vld [vmem:[%s1684_s29 + $0x170] sm:$0xff]  ;;  %v1547_v43 = vld [vmem:[%s1684_s29 + $0x40] sm:$0xff] }
  0x1b   : > { %v1560_v44 = vld [vmem:[%s1684_s29 + $0xa8] sm:$0xff]  ;;  %v1573_v47 = vld [vmem:[%s1684_s29 + $0x110] sm:$0xff]  ;;  %v1586_v48 = vld [vmem:[%s1684_s29 + $0x178] sm:$0xff] }
  0x1c   : > { %v1548_v61 = vld [vmem:[%s1684_s29 + $0x48] sm:$0xff]  ;;  %v1561_v62 = vld [vmem:[%s1684_s29 + $0xb0] sm:$0xff]  ;;  %v1574_v4 = vld [vmem:[%s1684_s29 + $0x118] sm:$0xff] }
  0x1d   : > { %745 = vmatpush.bf16.msra.mxu0 %v1592_v9  ;;  %1605 = vmatpush.bf16.msra.mxu1 %v1592_v9  ;;  %v1587_v5 = vld [vmem:[%s1684_s29 + $0x180] sm:$0xff] }
  0x1e   : > { %1606 = vmatpush.bf16.msra.mxu2 %v1592_v9  ;;  %1607 = vmatpush.bf16.msra.mxu3 %v1592_v9 }
  0x21   : > { %746 = vmatpush.bf16.msra.mxu0 %v1591_v10  ;;  %1608 = vmatpush.bf16.msra.mxu1 %v1591_v10 }
  0x22   : > { %1609 = vmatpush.bf16.msra.mxu2 %v1591_v10  ;;  %1610 = vmatpush.bf16.msra.mxu3 %v1591_v10 }
  0x24   : > { %1485 = vmatmul.msk.bf16.vlgmr.msra.gmra.mxu0 %vm575_vm2, %v1539_v11  ;;  %1498 = vmatmul.msk.bf16.vlgmr.msra.gmra.mxu1 %vm575_vm2, %v1552_v12 }
  0x25   : > { %1511 = vmatmul.msk.bf16.vlgmr.msra.gmra.mxu2 %vm575_vm2, %v1565_v13  ;;  %1524 = vmatmul.msk.bf16.vlgmr.msra.gmra.mxu3 %vm575_vm2, %v1578_v14 }
  0x34   : > { %1486 = vmatmul.msk.bf16.gmra.mxu0 %vm575_vm2, %v1540_v15  ;;  %1499 = vmatmul.msk.bf16.gmra.mxu1 %vm575_vm2, %v1553_v16 }
  0x35   : > { %1512 = vmatmul.msk.bf16.gmra.mxu2 %vm575_vm2, %v1566_v17  ;;  %1525 = vmatmul.msk.bf16.gmra.mxu3 %vm575_vm2, %v1579_v18 }
  0x44   : > { %1487 = vmatmul.msk.bf16.gmra.mxu0 %vm575_vm2, %v1541_v19  ;;  %1500 = vmatmul.msk.bf16.gmra.mxu1 %vm575_vm2, %v1554_v20 }
  0x45   : > { %1513 = vmatmul.msk.bf16.gmra.mxu2 %vm575_vm2, %v1567_v21  ;;  %1526 = vmatmul.msk.bf16.gmra.mxu3 %vm575_vm2, %v1580_v22  ;;  %v1549_v21 = vld [vmem:[%s1684_s29 + $0x50] sm:$0xff]  ;;  %v1562_v22 = vld [vmem:[%s1684_s29 + $0xb8] sm:$0xff] }
  0x54   : > { %1488 = vmatmul.msk.bf16.gmra.mxu0 %vm575_vm2, %v1542_v23  ;;  %1501 = vmatmul.msk.bf16.gmra.mxu1 %vm575_vm2, %v1555_v24 }
  0x55   : > { %1514 = vmatmul.msk.bf16.gmra.mxu2 %vm575_vm2, %v1568_v25  ;;  %1527 = vmatmul.msk.bf16.gmra.mxu3 %vm575_vm2, %v1581_v26 }
  0x64   : > { %1489 = vmatmul.msk.bf16.gmra.mxu0 %vm575_vm2, %v1543_v27  ;;  %1502 = vmatmul.msk.bf16.gmra.mxu1 %vm575_vm2, %v1556_v28  ;;  %v1575_v28 = vld [vmem:[%s1684_s29 + $0x120] sm:$0xff] }
  0x65   : > { %1515 = vmatmul.msk.bf16.gmra.mxu2 %vm575_vm2, %v1569_v29  ;;  %1528 = vmatmul.msk.bf16.gmra.mxu3 %vm575_vm2, %v1582_v30  ;;  %v1588_v29 = vld [vmem:[%s1684_s29 + $0x188] sm:$0xff] }
  0x74   : > { %1490 = vmatmul.msk.bf16.gmra.mxu0 %vm575_vm2, %v1544_v31  ;;  %1503 = vmatmul.msk.bf16.gmra.mxu1 %vm575_vm2, %v1557_v32 }
  0x75   : > { %1516 = vmatmul.msk.bf16.gmra.mxu2 %vm575_vm2, %v1570_v33  ;;  %1529 = vmatmul.msk.bf16.gmra.mxu3 %vm575_vm2, %v1583_v34 }
  0x84   : > { %1491 = vmatmul.msk.bf16.gmra.mxu0 %vm575_vm2, %v1545_v35  ;;  %1504 = vmatmul.msk.bf16.gmra.mxu1 %vm575_vm2, %v1558_v36 }
  0x85   : > { %1517 = vmatmul.msk.bf16.gmra.mxu2 %vm575_vm2, %v1571_v37  ;;  %1530 = vmatmul.msk.bf16.gmra.mxu3 %vm575_vm2, %v1584_v38 }
  0x94   : > { %1492 = vmatmul.msk.bf16.gmra.mxu0 %vm575_vm2, %v1546_v39  ;;  %1505 = vmatmul.msk.bf16.gmra.mxu1 %vm575_vm2, %v1559_v40 }
  0x95   : > { %1518 = vmatmul.msk.bf16.gmra.mxu2 %vm575_vm2, %v1572_v41  ;;  %1531 = vmatmul.msk.bf16.gmra.mxu3 %vm575_vm2, %v1585_v42 }
  0xa1   : > { %v748_v45 = vpop.f32.mrf.mxu0  ;;  %v813_v46 = vpop.f32.mrf.mxu1 }
  0xa2   : > { %v1008_v49 = vmax.f32 %v748_v45, %v813_v46  ;;  %v1550_v45 = vld [vmem:[%s1684_s29 + $0x58] sm:$0xff]  ;;  %v1563_v46 = vld [vmem:[%s1684_s29 + $0xc0] sm:$0xff] }
  0xa4   : > { %1493 = vmatmul.msk.bf16.gmra.mxu0 %vm575_vm2, %v1547_v43  ;;  %1506 = vmatmul.msk.bf16.gmra.mxu1 %vm575_vm2, %v1560_v44 }
  0xa5   : > { %1519 = vmatmul.msk.bf16.gmra.mxu2 %vm575_vm2, %v1573_v47  ;;  %1532 = vmatmul.msk.bf16.gmra.mxu3 %vm575_vm2, %v1586_v48 }
  0xa8   : > { %v878_v50 = vpop.f32.mrf.mxu2  ;;  %v943_v51 = vpop.f32.mrf.mxu3 }
  0xa9   : > { %v1034_v52 = vmax.f32 %v878_v50, %v943_v51  ;;  %v750_v54 = vpop.f32.mrf.mxu0  ;;  %v815_v55 = vpop.f32.mrf.mxu1 }
  0xaa   : > { %v1009_v0 = vmax.f32 %v750_v54, %v815_v55  ;;  %v1589_v54 = vld [vmem:[%s1684_s29 + $0x190] sm:$0xff] }
  0xab   : > { %v1060_v56 = vmax.f32 %v1008_v49, %v1034_v52  ;;  %v1576_v52 = vld [vmem:[%s1684_s29 + $0x128] sm:$0xff] }
  0xad   : > { %v1090_v57 = vadd.f32 %v1761_v53, %v1060_v56 }
  0xaf   : > { %v1116_v58 = vmax.f32 %v1090_v57, 0.0 }
  0xb0   : > { %v880_v59 = vpop.f32.mrf.mxu2  ;;  %v945_v60 = vpop.f32.mrf.mxu3 }
  0xb1   : > { %v1142_v63 = vpack.c.bf16 %v1116_v58, %v1116_v58  ;;  %v1035_v1 = vmax.f32 %v880_v59, %v945_v60  ;;  %v753_v2 = vpop.f32.mrf.mxu0  ;;  %v818_v3 = vpop.f32.mrf.mxu1 }
  0xb2   : > { %v1010_v9 = vmax.f32 %v753_v2, %v818_v3 }
  0xb3   : > { %1169 = vst.msk [vmem:[%s1768_s8] sm:$0xf] %vm1168_vm3, %v1142_v63  ;;  %v1061_v6 = vmax.f32 %v1009_v0, %v1035_v1 }
  0xb4   : > { %1494 = vmatmul.msk.bf16.gmra.mxu0 %vm575_vm2, %v1548_v61  ;;  %1507 = vmatmul.msk.bf16.gmra.mxu1 %vm575_vm2, %v1561_v62 }
  0xb5   : > { %v1091_v7 = vadd.f32 %v1761_v53, %v1061_v6  ;;  %1520 = vmatmul.msk.bf16.gmra.mxu2 %vm575_vm2, %v1574_v4  ;;  %1533 = vmatmul.msk.bf16.gmra.mxu3 %vm575_vm2, %v1587_v5  ;;  %v1551_v6 = vld [vmem:[%s1684_s29 + $0x60] sm:$0xff] }
  0xb7   : > { %v1117_v8 = vmax.f32 %v1091_v7, 0.0  ;;  %v1564_v7 = vld [vmem:[%s1684_s29 + $0xc8] sm:$0xff] }
  0xb8   : > { %v883_v10 = vpop.f32.mrf.mxu2  ;;  %v948_v11 = vpop.f32.mrf.mxu3 }
  0xb9   : > { %v1143_v12 = vpack.c.bf16 %v1117_v8, %v1117_v8  ;;  %v1036_v13 = vmax.f32 %v883_v10, %v948_v11  ;;  %v755_v14 = vpop.f32.mrf.mxu0  ;;  %v820_v15 = vpop.f32.mrf.mxu1 }
  0xba   : > { %v1011_v24 = vmax.f32 %v755_v14, %v820_v15  ;;  %v1590_v14 = vld [vmem:[%s1684_s29 + $0x198] sm:$0xff] }
  0xbb   : > { %1170 = vst.msk [vmem:[%s1768_s8 + $0x4] sm:$0xf] %vm1168_vm3, %v1143_v12  ;;  %v1062_v16 = vmax.f32 %v1010_v9, %v1036_v13  ;;  %v1577_v13 = vld [vmem:[%s1684_s29 + $0x130] sm:$0xff] }
  0xbd   : > { %v1092_v17 = vadd.f32 %v1761_v53, %v1062_v16 }
  0xbf   : > { %v1118_v18 = vmax.f32 %v1092_v17, 0.0 }
  0xc0   : > { %v885_v19 = vpop.f32.mrf.mxu2  ;;  %v950_v20 = vpop.f32.mrf.mxu3 }
  0xc1   : > { %v1144_v23 = vpack.c.bf16 %v1118_v18, %v1118_v18  ;;  %v1037_v25 = vmax.f32 %v885_v19, %v950_v20  ;;  %v758_v26 = vpop.f32.mrf.mxu0  ;;  %v823_v27 = vpop.f32.mrf.mxu1 }
  0xc2   : > { %v1012_v33 = vmax.f32 %v758_v26, %v823_v27 }
  0xc3   : > { %1171 = vst.msk [vmem:[%s1768_s8 + $0x8] sm:$0xf] %vm1168_vm3, %v1144_v23  ;;  %v1063_v30 = vmax.f32 %v1011_v24, %v1037_v25 }
  0xc4   : > { %1495 = vmatmul.msk.bf16.gmra.mxu0 %vm575_vm2, %v1549_v21  ;;  %1508 = vmatmul.msk.bf16.gmra.mxu1 %vm575_vm2, %v1562_v22 }
  0xc5   : > { %v1093_v31 = vadd.f32 %v1761_v53, %v1063_v30  ;;  %1521 = vmatmul.msk.bf16.gmra.mxu2 %vm575_vm2, %v1575_v28  ;;  %1534 = vmatmul.msk.bf16.gmra.mxu3 %vm575_vm2, %v1588_v29 }
  0xc7   : > { %v1119_v32 = vmax.f32 %v1093_v31, 0.0 }
  0xc8   : > { %v888_v34 = vpop.f32.mrf.mxu2  ;;  %v953_v35 = vpop.f32.mrf.mxu3 }
  0xc9   : > { %v1145_v36 = vpack.c.bf16 %v1119_v32, %v1119_v32  ;;  %v1038_v37 = vmax.f32 %v888_v34, %v953_v35  ;;  %v760_v38 = vpop.f32.mrf.mxu0  ;;  %v825_v39 = vpop.f32.mrf.mxu1 }
  0xca   : > { %v1013_v48 = vmax.f32 %v760_v38, %v825_v39 }
  0xcb   : > { %1172 = vst.msk [vmem:[%s1768_s8 + $0xc] sm:$0xf] %vm1168_vm3, %v1145_v36  ;;  %v1064_v40 = vmax.f32 %v1012_v33, %v1038_v37 }
  0xcd   : > { %v1094_v41 = vadd.f32 %v1761_v53, %v1064_v40 }
  0xcf   : > { %v1120_v42 = vmax.f32 %v1094_v41, 0.0 }
  0xd0   : > { %v890_v43 = vpop.f32.mrf.mxu2  ;;  %v955_v44 = vpop.f32.mrf.mxu3 }
  0xd1   : > { %v1146_v47 = vpack.c.bf16 %v1120_v42, %v1120_v42  ;;  %v1039_v49 = vmax.f32 %v890_v43, %v955_v44  ;;  %v763_v50 = vpop.f32.mrf.mxu0  ;;  %v828_v51 = vpop.f32.mrf.mxu1 }
  0xd2   : > { %v1014_v58 = vmax.f32 %v763_v50, %v828_v51 }
  0xd3   : > { %1173 = vst.msk [vmem:[%s1768_s8 + $0x10] sm:$0xf] %vm1168_vm3, %v1146_v47  ;;  %v1065_v55 = vmax.f32 %v1013_v48, %v1039_v49 }
  0xd4   : > { %1496 = vmatmul.msk.bf16.gmra.mxu0 %vm575_vm2, %v1550_v45  ;;  %1509 = vmatmul.msk.bf16.gmra.mxu1 %vm575_vm2, %v1563_v46 }
  0xd5   : > { %v1095_v56 = vadd.f32 %v1761_v53, %v1065_v55  ;;  %1522 = vmatmul.msk.bf16.gmra.mxu2 %vm575_vm2, %v1576_v52  ;;  %1535 = vmatmul.msk.bf16.gmra.mxu3 %vm575_vm2, %v1589_v54 }
  0xd7   : > { %v1121_v57 = vmax.f32 %v1095_v56, 0.0 }
  0xd8   : > { %v893_v59 = vpop.f32.mrf.mxu2  ;;  %v958_v60 = vpop.f32.mrf.mxu3 }
  0xd9   : > { %v1147_v61 = vpack.c.bf16 %v1121_v57, %v1121_v57  ;;  %v1040_v62 = vmax.f32 %v893_v59, %v958_v60  ;;  %v765_v63 = vpop.f32.mrf.mxu0  ;;  %v830_v0 = vpop.f32.mrf.mxu1 }
  0xda   : > { %v1015_v9 = vmax.f32 %v765_v63, %v830_v0 }
  0xdb   : > { %1174 = vst.msk [vmem:[%s1768_s8 + $0x14] sm:$0xf] %vm1168_vm3, %v1147_v61  ;;  %v1066_v1 = vmax.f32 %v1014_v58, %v1040_v62 }
  0xdd   : > { %v1096_v2 = vadd.f32 %v1761_v53, %v1066_v1 }
  0xdf   : > { %v1122_v3 = vmax.f32 %v1096_v2, 0.0 }
  0xe0   : > { %v895_v4 = vpop.f32.mrf.mxu2  ;;  %v960_v5 = vpop.f32.mrf.mxu3 }
  0xe1   : > { %v1148_v8 = vpack.c.bf16 %v1122_v3, %v1122_v3  ;;  %v1041_v10 = vmax.f32 %v895_v4, %v960_v5  ;;  %v768_v11 = vpop.f32.mrf.mxu0  ;;  %v833_v12 = vpop.f32.mrf.mxu1 }
  0xe2   : > { %v1016_v18 = vmax.f32 %v768_v11, %v833_v12 }
  0xe3   : > { %1175 = vst.msk [vmem:[%s1768_s8 + $0x18] sm:$0xf] %vm1168_vm3, %v1148_v8  ;;  %v1067_v15 = vmax.f32 %v1015_v9, %v1041_v10 }
  0xe4   : > { %1497 = vmatmul.msk.bf16.gmra.mxu0 %vm575_vm2, %v1551_v6  ;;  %1510 = vmatmul.msk.bf16.gmra.mxu1 %vm575_vm2, %v1564_v7 }
  0xe5   : > { %v1097_v16 = vadd.f32 %v1761_v53, %v1067_v15  ;;  %1523 = vmatmul.msk.bf16.gmra.mxu2 %vm575_vm2, %v1577_v13  ;;  %1536 = vmatmul.msk.bf16.gmra.mxu3 %vm575_vm2, %v1590_v14 }
  0xe7   : > { %v1123_v17 = vmax.f32 %v1097_v16, 0.0 }
  0xe8   : > { %v898_v19 = vpop.f32.mrf.mxu2  ;;  %v963_v20 = vpop.f32.mrf.mxu3 }
  0xe9   : > { %v1149_v21 = vpack.c.bf16 %v1123_v17, %v1123_v17  ;;  %v1042_v22 = vmax.f32 %v898_v19, %v963_v20  ;;  %v770_v23 = vpop.f32.mrf.mxu0  ;;  %v835_v24 = vpop.f32.mrf.mxu1 }
  0xea   : > { %v1017_v31 = vmax.f32 %v770_v23, %v835_v24 }
  0xeb   : > { %1176 = vst.msk [vmem:[%s1768_s8 + $0x1c] sm:$0xf] %vm1168_vm3, %v1149_v21  ;;  %v1068_v25 = vmax.f32 %v1016_v18, %v1042_v22 }
  0xed   : > { %v1098_v26 = vadd.f32 %v1761_v53, %v1068_v25 }
  0xef   : > { %v1124_v27 = vmax.f32 %v1098_v26, 0.0 }
  0xf0   : > { %v900_v28 = vpop.f32.mrf.mxu2  ;;  %v965_v29 = vpop.f32.mrf.mxu3 }
  0xf1   : > { %v1150_v30 = vpack.c.bf16 %v1124_v27, %v1124_v27  ;;  %v1043_v32 = vmax.f32 %v900_v28, %v965_v29  ;;  %v773_v33 = vpop.f32.mrf.mxu0  ;;  %v838_v34 = vpop.f32.mrf.mxu1 }
  0xf2   : > { %v1018_v38 = vmax.f32 %v773_v33, %v838_v34 }
  0xf3   : > { %1177 = vst.msk [vmem:[%s1768_s8 + $0x20] sm:$0xf] %vm1168_vm3, %v1150_v30  ;;  %v1069_v35 = vmax.f32 %v1017_v31, %v1043_v32 }
  0xf5   : > { %v1099_v36 = vadd.f32 %v1761_v53, %v1069_v35 }
  0xf7   : > { %v1125_v37 = vmax.f32 %v1099_v36, 0.0 }
  0xf8   : > { %v903_v39 = vpop.f32.mrf.mxu2  ;;  %v968_v40 = vpop.f32.mrf.mxu3 }
  0xf9   : > { %v1151_v41 = vpack.c.bf16 %v1125_v37, %v1125_v37  ;;  %v1044_v42 = vmax.f32 %v903_v39, %v968_v40  ;;  %v775_v43 = vpop.f32.mrf.mxu0  ;;  %v840_v44 = vpop.f32.mrf.mxu1 }
  0xfa   : > { %v1019_v51 = vmax.f32 %v775_v43, %v840_v44 }
  0xfb   : > { %1178 = vst.msk [vmem:[%s1768_s8 + $0x24] sm:$0xf] %vm1168_vm3, %v1151_v41  ;;  %v1070_v45 = vmax.f32 %v1018_v38, %v1044_v42 }
  0xfd   : > { %v1100_v46 = vadd.f32 %v1761_v53, %v1070_v45 }
  0xff   : > { %v1126_v47 = vmax.f32 %v1100_v46, 0.0 }
 0x100   : > { %v905_v48 = vpop.f32.mrf.mxu2  ;;  %v970_v49 = vpop.f32.mrf.mxu3 }
 0x101   : > { %v1152_v50 = vpack.c.bf16 %v1126_v47, %v1126_v47  ;;  %v1045_v52 = vmax.f32 %v905_v48, %v970_v49  ;;  %v778_v54 = vpop.f32.mrf.mxu0  ;;  %v843_v55 = vpop.f32.mrf.mxu1 }
 0x102   : > { %v1020_v59 = vmax.f32 %v778_v54, %v843_v55 }
 0x103   : > { %1179 = vst.msk [vmem:[%s1768_s8 + $0x28] sm:$0xf] %vm1168_vm3, %v1152_v50  ;;  %v1071_v56 = vmax.f32 %v1019_v51, %v1045_v52 }
 0x105   : > { %v1101_v57 = vadd.f32 %v1761_v53, %v1071_v56 }
 0x107   : > { %v1127_v58 = vmax.f32 %v1101_v57, 0.0 }
 0x108   : > { %v908_v60 = vpop.f32.mrf.mxu2  ;;  %v973_v61 = vpop.f32.mrf.mxu3 }
 0x109   : > { %v1153_v62 = vpack.c.bf16 %v1127_v58, %v1127_v58  ;;  %v1046_v63 = vmax.f32 %v908_v60, %v973_v61  ;;  %v780_v0 = vpop.f32.mrf.mxu0  ;;  %v845_v1 = vpop.f32.mrf.mxu1 }
 0x10a   : > { %v1021_v8 = vmax.f32 %v780_v0, %v845_v1 }
 0x10b   : > { %1180 = vst.msk [vmem:[%s1768_s8 + $0x2c] sm:$0xf] %vm1168_vm3, %v1153_v62  ;;  %v1072_v2 = vmax.f32 %v1020_v59, %v1046_v63 }
 0x10d   : > { %v1102_v3 = vadd.f32 %v1761_v53, %v1072_v2 }
 0x10f   : > { %v1128_v4 = vmax.f32 %v1102_v3, 0.0 }
 0x110   : > { %v910_v5 = vpop.f32.mrf.mxu2  ;;  %v975_v6 = vpop.f32.mrf.mxu3 }
 0x111   : > { %v1154_v7 = vpack.c.bf16 %v1128_v4, %v1128_v4  ;;  %v1047_v9 = vmax.f32 %v910_v5, %v975_v6  ;;  %v783_v10 = vpop.f32.mrf.mxu0  ;;  %v848_v11 = vpop.f32.mrf.mxu1 }
 0x112   : > { %v1022_v15 = vmax.f32 %v783_v10, %v848_v11 }
 0x113   : > { %1181 = vst.msk [vmem:[%s1768_s8 + $0x30] sm:$0xf] %vm1168_vm3, %v1154_v7  ;;  %v1073_v12 = vmax.f32 %v1021_v8, %v1047_v9 }
 0x115   : > { %v1103_v13 = vadd.f32 %v1761_v53, %v1073_v12 }
 0x117   : > { %v1129_v14 = vmax.f32 %v1103_v13, 0.0 }
 0x118   : > { %v913_v16 = vpop.f32.mrf.mxu2  ;;  %v978_v17 = vpop.f32.mrf.mxu3 }
 0x119   : > { %v1155_v18 = vpack.c.bf16 %v1129_v14, %v1129_v14  ;;  %v1048_v19 = vmax.f32 %v913_v16, %v978_v17  ;;  %v785_v20 = vpop.f32.mrf.mxu0  ;;  %v850_v21 = vpop.f32.mrf.mxu1 }
 0x11a   : > { %v1023_v28 = vmax.f32 %v785_v20, %v850_v21 }
 0x11b   : > { %1182 = vst.msk [vmem:[%s1768_s8 + $0x34] sm:$0xf] %vm1168_vm3, %v1155_v18  ;;  %v1074_v22 = vmax.f32 %v1022_v15, %v1048_v19 }
 0x11d   : > { %v1104_v23 = vadd.f32 %v1761_v53, %v1074_v22 }
 0x11f   : > { %v1130_v24 = vmax.f32 %v1104_v23, 0.0 }
 0x120   : > { %v915_v25 = vpop.f32.mrf.mxu2  ;;  %v980_v26 = vpop.f32.mrf.mxu3 }
 0x121   : > { %v1156_v27 = vpack.c.bf16 %v1130_v24, %v1130_v24  ;;  %v1049_v29 = vmax.f32 %v915_v25, %v980_v26  ;;  %v788_v30 = vpop.f32.mrf.mxu0  ;;  %v853_v31 = vpop.f32.mrf.mxu1 }
 0x122   : > { %v1024_v35 = vmax.f32 %v788_v30, %v853_v31 }
 0x123   : > { %1183 = vst.msk [vmem:[%s1768_s8 + $0x38] sm:$0xf] %vm1168_vm3, %v1156_v27  ;;  %v1075_v32 = vmax.f32 %v1023_v28, %v1049_v29 }
 0x125   : > { %v1105_v33 = vadd.f32 %v1761_v53, %v1075_v32 }
 0x127   : > { %v1131_v34 = vmax.f32 %v1105_v33, 0.0 }
 0x128   : > { %v918_v36 = vpop.f32.mrf.mxu2  ;;  %v983_v37 = vpop.f32.mrf.mxu3 }
 0x129   : > { %v1157_v38 = vpack.c.bf16 %v1131_v34, %v1131_v34  ;;  %v1050_v39 = vmax.f32 %v918_v36, %v983_v37  ;;  %v790_v40 = vpop.f32.mrf.mxu0  ;;  %v855_v41 = vpop.f32.mrf.mxu1 }
 0x12a   : > { %v1025_v48 = vmax.f32 %v790_v40, %v855_v41 }
 0x12b   : > { %1184 = vst.msk [vmem:[%s1768_s8 + $0x3c] sm:$0xf] %vm1168_vm3, %v1157_v38  ;;  %v1076_v42 = vmax.f32 %v1024_v35, %v1050_v39 }
 0x12d   : > { %v1106_v43 = vadd.f32 %v1761_v53, %v1076_v42 }
 0x12f   : > { %v1132_v44 = vmax.f32 %v1106_v43, 0.0 }
 0x130   : > { %v920_v45 = vpop.f32.mrf.mxu2  ;;  %v985_v46 = vpop.f32.mrf.mxu3 }
 0x131   : > { %v1158_v47 = vpack.c.bf16 %v1132_v44, %v1132_v44  ;;  %v1051_v49 = vmax.f32 %v920_v45, %v985_v46  ;;  %v793_v50 = vpop.f32.mrf.mxu0  ;;  %v858_v51 = vpop.f32.mrf.mxu1 }
 0x132   : > { %v1026_v56 = vmax.f32 %v793_v50, %v858_v51 }
 0x133   : > { %1185 = vst.msk [vmem:[%s1768_s8 + $0x40] sm:$0xf] %vm1168_vm3, %v1158_v47  ;;  %v1077_v52 = vmax.f32 %v1025_v48, %v1051_v49 }
 0x135   : > { %v1107_v54 = vadd.f32 %v1761_v53, %v1077_v52 }
 0x137   : > { %v1133_v55 = vmax.f32 %v1107_v54, 0.0 }
 0x138   : > { %v923_v57 = vpop.f32.mrf.mxu2  ;;  %v988_v58 = vpop.f32.mrf.mxu3 }
 0x139   : > { %v1159_v59 = vpack.c.bf16 %v1133_v55, %v1133_v55  ;;  %v1052_v60 = vmax.f32 %v923_v57, %v988_v58  ;;  %v795_v61 = vpop.f32.mrf.mxu0  ;;  %v860_v62 = vpop.f32.mrf.mxu1 }
 0x13a   : > { %v1027_v5 = vmax.f32 %v795_v61, %v860_v62 }
 0x13b   : > { %1186 = vst.msk [vmem:[%s1768_s8 + $0x44] sm:$0xf] %vm1168_vm3, %v1159_v59  ;;  %v1078_v63 = vmax.f32 %v1026_v56, %v1052_v60 }
 0x13d   : > { %v1108_v0 = vadd.f32 %v1761_v53, %v1078_v63 }
 0x13f   : > { %v1134_v1 = vmax.f32 %v1108_v0, 0.0 }
 0x140   : > { %v925_v2 = vpop.f32.mrf.mxu2  ;;  %v990_v3 = vpop.f32.mrf.mxu3 }
 0x141   : > { %v1160_v4 = vpack.c.bf16 %v1134_v1, %v1134_v1  ;;  %v1053_v6 = vmax.f32 %v925_v2, %v990_v3  ;;  %v798_v7 = vpop.f32.mrf.mxu0  ;;  %v863_v8 = vpop.f32.mrf.mxu1 }
 0x142   : > { %v1028_v12 = vmax.f32 %v798_v7, %v863_v8 }
 0x143   : > { %1187 = vst.msk [vmem:[%s1768_s8 + $0x48] sm:$0xf] %vm1168_vm3, %v1160_v4  ;;  %v1079_v9 = vmax.f32 %v1027_v5, %v1053_v6 }
 0x145   : > { %v1109_v10 = vadd.f32 %v1761_v53, %v1079_v9 }
 0x147   : > { %v1135_v11 = vmax.f32 %v1109_v10, 0.0 }
 0x148   : > { %v928_v13 = vpop.f32.mrf.mxu2  ;;  %v993_v14 = vpop.f32.mrf.mxu3 }
 0x149   : > { %v1161_v15 = vpack.c.bf16 %v1135_v11, %v1135_v11  ;;  %v1054_v16 = vmax.f32 %v928_v13, %v993_v14  ;;  %v800_v17 = vpop.f32.mrf.mxu0  ;;  %v865_v18 = vpop.f32.mrf.mxu1 }
 0x14a   : > { %v1029_v25 = vmax.f32 %v800_v17, %v865_v18 }
 0x14b   : > { %1188 = vst.msk [vmem:[%s1768_s8 + $0x4c] sm:$0xf] %vm1168_vm3, %v1161_v15  ;;  %v1080_v19 = vmax.f32 %v1028_v12, %v1054_v16 }
 0x14d   : > { %v1110_v20 = vadd.f32 %v1761_v53, %v1080_v19 }
 0x14f   : > { %v1136_v21 = vmax.f32 %v1110_v20, 0.0 }
 0x150   : > { %v930_v22 = vpop.f32.mrf.mxu2  ;;  %v995_v23 = vpop.f32.mrf.mxu3 }
 0x151   : > { %v1162_v24 = vpack.c.bf16 %v1136_v21, %v1136_v21  ;;  %v1055_v26 = vmax.f32 %v930_v22, %v995_v23  ;;  %v803_v27 = vpop.f32.mrf.mxu0  ;;  %v868_v28 = vpop.f32.mrf.mxu1 }
 0x152   : > { %v1030_v32 = vmax.f32 %v803_v27, %v868_v28 }
 0x153   : > { %1189 = vst.msk [vmem:[%s1768_s8 + $0x50] sm:$0xf] %vm1168_vm3, %v1162_v24  ;;  %v1081_v29 = vmax.f32 %v1029_v25, %v1055_v26 }
 0x155   : > { %v1111_v30 = vadd.f32 %v1761_v53, %v1081_v29 }
 0x157   : > { %v1137_v31 = vmax.f32 %v1111_v30, 0.0 }
 0x158   : > { %v933_v33 = vpop.f32.mrf.mxu2  ;;  %v998_v34 = vpop.f32.mrf.mxu3 }
 0x159   : > { %v1163_v35 = vpack.c.bf16 %v1137_v31, %v1137_v31  ;;  %v1056_v36 = vmax.f32 %v933_v33, %v998_v34  ;;  %v805_v37 = vpop.f32.mrf.mxu0  ;;  %v870_v38 = vpop.f32.mrf.mxu1 }
 0x15a   : > { %v1031_v45 = vmax.f32 %v805_v37, %v870_v38 }
 0x15b   : > { %1190 = vst.msk [vmem:[%s1768_s8 + $0x54] sm:$0xf] %vm1168_vm3, %v1163_v35  ;;  %v1082_v39 = vmax.f32 %v1030_v32, %v1056_v36 }
 0x15d   : > { %v1112_v40 = vadd.f32 %v1761_v53, %v1082_v39 }
 0x15f   : > { %v1138_v41 = vmax.f32 %v1112_v40, 0.0 }
 0x160   : > { %v935_v42 = vpop.f32.mrf.mxu2  ;;  %v1000_v43 = vpop.f32.mrf.mxu3 }
 0x161   : > { %v1164_v44 = vpack.c.bf16 %v1138_v41, %v1138_v41  ;;  %v1057_v46 = vmax.f32 %v935_v42, %v1000_v43  ;;  %v808_v48 = vpop.f32.mrf.mxu0  ;;  %v873_v49 = vpop.f32.mrf.mxu1 }
 0x162   : > { %v1032_v52 = vmax.f32 %v808_v48, %v873_v49 }
 0x163   : > { %1191 = vst.msk [vmem:[%s1768_s8 + $0x58] sm:$0xf] %vm1168_vm3, %v1164_v44  ;;  %v1083_v47 = vmax.f32 %v1031_v45, %v1057_v46 }
 0x165   : > { %v1113_v50 = vadd.f32 %v1761_v53, %v1083_v47 }
 0x167   : > { %v1139_v51 = vmax.f32 %v1113_v50, 0.0 }
 0x168   : > { %v938_v54 = vpop.f32.mrf.mxu2  ;;  %v1003_v55 = vpop.f32.mrf.mxu3 }
 0x169   : > { %v1165_v56 = vpack.c.bf16 %v1139_v51, %v1139_v51  ;;  %v1058_v57 = vmax.f32 %v938_v54, %v1003_v55  ;;  %v810_v60 = vpop.f32.mrf.mxu0  ;;  %v875_v61 = vpop.f32.mrf.mxu1 }
 0x16a   : > { %v1033_v2 = vmax.f32 %v810_v60, %v875_v61 }
 0x16b   : > { %1192 = vst.msk [vmem:[%s1768_s8 + $0x5c] sm:$0xf] %vm1168_vm3, %v1165_v56  ;;  %v1084_v58 = vmax.f32 %v1032_v52, %v1058_v57 }
 0x16d   : > { %v1114_v59 = vadd.f32 %v1761_v53, %v1084_v58 }
 0x16f   : > { %v1140_v62 = vmax.f32 %v1114_v59, 0.0 }
 0x170   : > { %v940_v63 = vpop.f32.mrf.mxu2  ;;  %v1005_v0 = vpop.f32.mrf.mxu3 }
 0x171   : > { %v1166_v1 = vpack.c.bf16 %v1140_v62, %v1140_v62  ;;  %v1059_v3 = vmax.f32 %v940_v63, %v1005_v0 }
 0x173   : > { %1193 = vst.msk [vmem:[%s1768_s8 + $0x60] sm:$0xf] %vm1168_vm3, %v1166_v1  ;;  %v1085_v4 = vmax.f32 %v1033_v2, %v1059_v3 }
 0x175   : > { %v1115_v5 = vadd.f32 %v1761_v53, %v1085_v4 }
 0x177   : > { %v1141_v6 = vmax.f32 %v1115_v5, 0.0 }
 0x179   : > { %v1167_v7 = vpack.c.bf16 %v1141_v6, %v1141_v6 }
 0x17b   : > { %1194 = vst.msk [vmem:[%s1768_s8 + $0x64] sm:$0xf] %vm1168_vm3, %v1167_v7 }
 0x17c PF: > { %s13_s12 = sadd.s32 1, %s1629_s12  }
 0x17d   : > { %p10_p4 = scmp.ge.s32.totalorder %s13_s12, 4  }
 0x17f   :  { %12 = sbr.rel (!%p10_p4) target bundleno = 1 (0x1), region = 62 }

// kernel: net_forward.4
= control target key start
LH: loop header
LB: loop body
LE: loop exit
PB: predicated region body
PF: predicated region fallthrough
CT: control target
= control target key end

     0   :  { %s744_s12 = smov 0   ;;  %s850_s0 = inlined_call_operand.vmem [shape: bf16[2,128,150], index: 0, kind: input, shape index: {}]   ;;  %s851_s1 = inlined_call_operand.vmem [shape: bf16[150,16], index: 1, kind: input, shape index: {}]   ;;  %s852_s2 = inlined_call_operand.vmem [shape: f32[1,16], index: 2, kind: input, shape index: {}]   ;;  %s853_s3 = inlined_call_operand.vmem [shape: bf16[2,32,16], index: 3, kind: output, shape index: {}]  }
   0x1 LB: > { %s551_s13 = sadd.s32 4294967295, %s722_s12   ;;  %p555_p0 = scmp.ge.s32.totalorder %s722_s12, 1  ;;  %s722_s12 = sphi %s744_s12, %s13_s12  }
   0x2   : > { %p137_p1 = scmp.lt.s32.totalorder %s722_s12, 3 }
   0x4   : > { %p138_p2 = pnand %p555_p0, %p137_p1 }
   0x5   : > { %p161_p3 = scmp.lt.s32.totalorder (!%p138_p2), %s551_s13, 1 }
   0x6   : > { %141 = sbr.rel (%p138_p2) target bundleno = 245 (0xf5), region = 32 }
   0xb   : > { %v695_v0 = vld [vmem:[%s851_s1 + $0x38] sm:$0xff]  ;;  %v206_v1 = vld [vmem:[%s851_s1 + $0x48] sm:$0x7]  ;;  %vm361_vm0 = vcmask 1042432   ;;  %v694_v3 = vld [vmem:[%s851_s1 + $0x30] sm:$0xff]  ;;  %s855_s13 = smov (!%p161_p3, %s551_s13), 1 }
   0xc   : > { %v316_v2 = vunpack.c.l.b16 %v206_v1  ;;  %365 = vmatpush.bf16.msra.mxu0 %v695_v0  ;;  %697 = vmatpush.bf16.msra.mxu2 %v695_v0  ;;  %s670_s20 = sshll.u32 %s855_s13, 7  ;;  %v696_v6 = vld [vmem:[%s851_s1 + $0x40] sm:$0xff]  ;;  %v693_v7 = vld [vmem:[%s851_s1 + $0x28] sm:$0xff]  ;;  %vm336_vm1 = vcmask 179200   ;;  %v691_v15 = vld [vmem:[%s851_s1 + $0x18] sm:$0xff]  ;;  %s671_s15 = sshll.u32 %s855_s13, 4 }
   0xd   : > { %s770_s25 = scalar_lea.vmem %s850_s0, %s670_s20  ;;  %v692_v13 = vld [vmem:[%s851_s1 + $0x20] sm:$0xff]  ;;  %v690_v16 = vld [vmem:[%s851_s1 + $0x10] sm:$0xff]  ;;  %v689_v17 = vld [vmem:[%s851_s1 + $0x8] sm:$0xff]  ;;  %s837_s18 = scalar_lea.vmem %s853_s3, %s671_s15  ;;  %vm491_vm2 = vcmask 125952  }
   0xe   : > { %v326_v4 = vpack.c.b16 %v316_v2, %v316_v2  ;;  %v672_v8 = vld [vmem:[%s770_s25 + $0x4] sm:$0xf]  ;;  %v564_v9 = vld [vmem:[%s770_s25 + $0x8] sm:$0xf0]  ;;  %v682_v10 = vld [vmem:[%s770_s25 + $0x54] sm:$0xf] }
   0xf   : > { %v567_v11 = vor.u32 %v672_v8, %v564_v9  ;;  %v604_v12 = vld [vmem:[%s770_s25 + $0x58] sm:$0xf0]  ;;  %v674_v18 = vld [vmem:[%s770_s25 + $0x14] sm:$0xf]  ;;  %v684_v20 = vld [vmem:[%s770_s25 + $0x64] sm:$0xf] }
  0x10   : > { %v363_v5 = vsel %vm361_vm0, %v326_v4, 0  ;;  %366 = vmatpush.bf16.msra.mxu0 %v694_v3  ;;  %698 = vmatpush.bf16.msra.mxu2 %v694_v3  ;;  %v607_v14 = vor.u32 %v682_v10, %v604_v12  ;;  %v572_v19 = vld [vmem:[%s770_s25 + $0x18] sm:$0xf0]  ;;  %v612_v21 = vld [vmem:[%s770_s25 + $0x68] sm:$0xf0]  ;;  %v688_v23 = vld [vmem:[%s851_s1] sm:$0xff] }
  0x11   : > { %420 = vmatpush.bf16.msra.mxu1 %v363_v5  ;;  %705 = vmatpush.bf16.msra.mxu3 %v363_v5  ;;  %v575_v22 = vor.u32 %v674_v18, %v572_v19  ;;  %v562_v24 = vld [vmem:[%s770_s25] sm:$0xf]  ;;  %v673_v25 = vld [vmem:[%s770_s25 + $0x4] sm:$0xf0]  ;;  %v615_v26 = vor.u32 %v684_v20, %v612_v21  ;;  %v676_v31 = vld [vmem:[%s770_s25 + $0x24] sm:$0xf] }
  0x12   : > { %v594_v27 = vld [vmem:[%s770_s25 + $0x40] sm:$0xf]  ;;  %v681_v28 = vld [vmem:[%s770_s25 + $0x44] sm:$0xf0]  ;;  %v563_v29 = vor.u32 %v673_v25, %v562_v24  ;;  %v580_v32 = vld [vmem:[%s770_s25 + $0x28] sm:$0xf0] }
  0x13   : > { %v595_v30 = vor.u32 %v681_v28, %v594_v27  ;;  %v686_v33 = vld [vmem:[%s770_s25 + $0x74] sm:$0xf]  ;;  %v620_v34 = vld [vmem:[%s770_s25 + $0x78] sm:$0xf0]  ;;  %v583_v35 = vor.u32 %v676_v31, %v580_v32  ;;  %v570_v36 = vld [vmem:[%s770_s25 + $0x10] sm:$0xf] }
  0x14   : > { %367 = vmatpush.bf16.msra.mxu0 %v693_v7  ;;  %699 = vmatpush.bf16.msra.mxu2 %v693_v7  ;;  %v675_v37 = vld [vmem:[%s770_s25 + $0x14] sm:$0xf0]  ;;  %v623_v38 = vor.u32 %v686_v33, %v620_v34  ;;  %v602_v39 = vld [vmem:[%s770_s25 + $0x50] sm:$0xf]  ;;  %v678_v43 = vld [vmem:[%s770_s25 + $0x34] sm:$0xf] }
  0x15   : > { %421 = vmatpush.bf16.msra.mxu1 %v696_v6  ;;  %706 = vmatpush.bf16.msra.mxu3 %v696_v6  ;;  %v683_v40 = vld [vmem:[%s770_s25 + $0x54] sm:$0xf0]  ;;  %v571_v41 = vor.u32 %v675_v37, %v570_v36  ;;  %v588_v44 = vld [vmem:[%s770_s25 + $0x38] sm:$0xf0]  ;;  %v578_v46 = vld [vmem:[%s770_s25 + $0x20] sm:$0xf] }
  0x16   : > { %v603_v42 = vor.u32 %v683_v40, %v602_v39  ;;  %v591_v45 = vor.u32 %v678_v43, %v588_v44  ;;  %v677_v47 = vld [vmem:[%s770_s25 + $0x24] sm:$0xf0]  ;;  %v610_v48 = vld [vmem:[%s770_s25 + $0x60] sm:$0xf]  ;;  %v680_v52 = vld [vmem:[%s770_s25 + $0x44] sm:$0xf] }
  0x17   : > { %v685_v49 = vld [vmem:[%s770_s25 + $0x64] sm:$0xf0]  ;;  %v579_v50 = vor.u32 %v677_v47, %v578_v46  ;;  %v596_v53 = vld [vmem:[%s770_s25 + $0x48] sm:$0xf0]  ;;  %v586_v55 = vld [vmem:[%s770_s25 + $0x30] sm:$0xf] }
  0x18   : > { %660 = vmatmul.msk.bf16.vlgmr.msra.gmra.mxu1 %vm336_vm1, %v567_v11  ;;  %368 = vmatpush.bf16.msra.mxu0 %v692_v13  ;;  %v611_v51 = vor.u32 %v685_v49, %v610_v48  ;;  %v599_v54 = vor.u32 %v680_v52, %v596_v53  ;;  %v679_v56 = vld [vmem:[%s770_s25 + $0x34] sm:$0xf0]  ;;  %v618_v57 = vld [vmem:[%s770_s25 + $0x70] sm:$0xf]  ;;  %v715_v27 = vld [vmem:[%s852_s2] ss:$0 sm:$0xff] }
  0x19   : > { %665 = vmatmul.msk.bf16.vlgmr.msra.gmra.mxu3 %vm336_vm1, %v607_v14  ;;  %700 = vmatpush.bf16.msra.mxu2 %v692_v13  ;;  %v687_v58 = vld [vmem:[%s770_s25 + $0x74] sm:$0xf0]  ;;  %v587_v59 = vor.u32 %v679_v56, %v586_v55 }
  0x1a   : > { %v619_v60 = vor.u32 %v687_v58, %v618_v57 }
  0x1c   : > { %369 = vmatpush.bf16.msra.mxu0 %v691_v15 }
  0x1d   : > { %701 = vmatpush.bf16.msra.mxu2 %v691_v15 }
  0x20   : > { %370 = vmatpush.bf16.msra.mxu0 %v690_v16 }
  0x21   : > { %702 = vmatpush.bf16.msra.mxu2 %v690_v16 }
  0x24   : > { %371 = vmatpush.bf16.msra.mxu0 %v689_v17 }
  0x25   : > { %703 = vmatpush.bf16.msra.mxu2 %v689_v17 }
  0x28   : > { %661 = vmatmul.msk.bf16.gmra.mxu1 %vm336_vm1, %v575_v22  ;;  %372 = vmatpush.bf16.msra.mxu0 %v688_v23 }
  0x29   : > { %666 = vmatmul.msk.bf16.gmra.mxu3 %vm336_vm1, %v615_v26  ;;  %704 = vmatpush.bf16.msra.mxu2 %v688_v23 }
  0x2b   : > { %373 = vmatmul.bf16.vlgmr.msra.gmra.mxu0 %v563_v29 }
  0x2c   : > { %393 = vmatmul.bf16.vlgmr.msra.gmra.mxu2 %v595_v30 }
  0x38   : > { %662 = vmatmul.msk.bf16.gmra.mxu1 %vm336_vm1, %v583_v35 }
  0x39   : > { %667 = vmatmul.msk.bf16.gmra.mxu3 %vm336_vm1, %v623_v38 }
  0x3b   : > { %378 = vmatmul.bf16.gmra.mxu0 %v571_v41 }
  0x3c   : > { %398 = vmatmul.bf16.gmra.mxu2 %v603_v42 }
  0x48   : > { %663 = vmatmul.msk.bf16.gmra.mxu1 %vm336_vm1, %v591_v45 }
  0x4b   : > { %383 = vmatmul.bf16.gmra.mxu0 %v579_v50 }
  0x4c   : > { %403 = vmatmul.bf16.gmra.mxu2 %v611_v51 }
  0x58   : > { %664 = vmatmul.msk.bf16.gmra.mxu1 %vm336_vm1, %v599_v54 }
  0x5b   : > { %388 = vmatmul.bf16.gmra.mxu0 %v587_v59 }
  0x5c   : > { %408 = vmatmul.bf16.gmra.mxu2 %v619_v60 }
  0x95   : > { %v423_v61 = vpop.f32.mrf.mxu1 }
  0x9c   : > { %v448_v5 = vpop.f32.mrf.mxu3 }
  0x9d   : > { %v425_v62 = vpop.f32.mrf.mxu1 }
  0xa4   : > { %v450_v10 = vpop.f32.mrf.mxu3 }
  0xa5   : > { %v428_v63 = vpop.f32.mrf.mxu1 }
  0xa8   : > { %v374_v0 = vpop.f32.mrf.mxu0 }
  0xa9   : > { %v424_v22 = vadd.f32 %v423_v61, %v374_v0 }
  0xac   : > { %v453_v15 = vpop.f32.mrf.mxu3 }
  0xad   : > { %v430_v1 = vpop.f32.mrf.mxu1 }
  0xaf   : > { %v394_v2 = vpop.f32.mrf.mxu2 }
  0xb0   : > { %v376_v3 = vpop.f32.mrf.mxu0 }
  0xb1   : > { %v426_v34 = vadd.f32 %v425_v62, %v376_v3 }
  0xb4   : > { %v455_v20 = vpop.f32.mrf.mxu3 }
  0xb5   : > { %v433_v4 = vpop.f32.mrf.mxu1 }
  0xb7   : > { %v396_v6 = vpop.f32.mrf.mxu2 }
  0xb8   : > { %v379_v7 = vpop.f32.mrf.mxu0 }
  0xb9   : > { %v429_v44 = vadd.f32 %v428_v63, %v379_v7 }
  0xbc   : > { %v458_v37 = vpop.f32.mrf.mxu3 }
  0xbd   : > { %v435_v8 = vpop.f32.mrf.mxu1 }
  0xbf   : > { %v399_v9 = vpop.f32.mrf.mxu2 }
  0xc0   : > { %v381_v11 = vpop.f32.mrf.mxu0  ;;  %v449_v45 = vadd.f32 %v448_v5, %v399_v9 }
  0xc1   : > { %v431_v59 = vadd.f32 %v430_v1, %v381_v11 }
  0xc4   : > { %v460_v57 = vpop.f32.mrf.mxu3 }
  0xc5   : > { %v438_v12 = vpop.f32.mrf.mxu1 }
  0xc7   : > { %v401_v13 = vpop.f32.mrf.mxu2 }
  0xc8   : > { %v384_v14 = vpop.f32.mrf.mxu0  ;;  %v451_v60 = vadd.f32 %v450_v10, %v401_v13 }
  0xc9   : > { %v434_v19 = vadd.f32 %v433_v4, %v384_v14 }
  0xcb   : > { %v463_v25 = vmax.f32 %v424_v22, %v434_v19 }
  0xcd   : > { %v440_v16 = vpop.f32.mrf.mxu1 }
  0xcf   : > { %v404_v17 = vpop.f32.mrf.mxu2 }
  0xd0   : > { %v386_v18 = vpop.f32.mrf.mxu0  ;;  %v454_v23 = vadd.f32 %v453_v15, %v404_v17 }
  0xd1   : > { %v436_v31 = vadd.f32 %v435_v8, %v386_v18 }
  0xd3   : > { %v464_v40 = vmax.f32 %v426_v34, %v436_v31 }
  0xd5   : > { %v443_v21 = vpop.f32.mrf.mxu1 }
  0xd6   : > { %v444_v24 = vadd.f32 %v443_v21, %v394_v2 }
  0xd7   : > { %v406_v28 = vpop.f32.mrf.mxu2 }
  0xd8   : > { %v467_v26 = vmax.f32 %v444_v24, %v454_v23  ;;  %v389_v30 = vpop.f32.mrf.mxu0  ;;  %v456_v36 = vadd.f32 %v455_v20, %v406_v28 }
  0xd9   : > { %v439_v39 = vadd.f32 %v438_v12, %v389_v30 }
  0xda   : > { %v471_v29 = vmax.f32 %v463_v25, %v467_v26 }
  0xdb   : > { %v465_v48 = vmax.f32 %v429_v44, %v439_v39 }
  0xdc   : > { %v479_v32 = vadd.f32 %v715_v27, %v471_v29 }
  0xdd   : > { %v445_v33 = vpop.f32.mrf.mxu1 }
  0xde   : > { %v483_v35 = vmax.f32 %v479_v32, 0.0  ;;  %v446_v38 = vadd.f32 %v445_v33, %v396_v6 }
  0xdf   : > { %v409_v43 = vpop.f32.mrf.mxu2 }
  0xe0   : > { %v487_v41 = vpack.c.bf16 %v483_v35, %v483_v35  ;;  %v468_v42 = vmax.f32 %v446_v38, %v456_v36  ;;  %v459_v46 = vadd.f32 %v458_v37, %v409_v43  ;;  %v391_v51 = vpop.f32.mrf.mxu0 }
  0xe1   : > { %v441_v55 = vadd.f32 %v440_v16, %v391_v51 }
  0xe2   : > { %492 = vst.msk [vmem:[%s837_s18] sm:$0xf] %vm491_vm2, %v487_v41  ;;  %v472_v47 = vmax.f32 %v464_v40, %v468_v42  ;;  %v469_v49 = vmax.f32 %v449_v45, %v459_v46 }
  0xe3   : > { %v466_v0 = vmax.f32 %v431_v59, %v441_v55 }
  0xe4   : > { %v480_v50 = vadd.f32 %v715_v27, %v472_v47  ;;  %v473_v52 = vmax.f32 %v465_v48, %v469_v49 }
  0xe6   : > { %v484_v53 = vmax.f32 %v480_v50, 0.0  ;;  %v481_v54 = vadd.f32 %v715_v27, %v473_v52 }
  0xe7   : > { %v411_v58 = vpop.f32.mrf.mxu2 }
  0xe8   : > { %v488_v56 = vpack.c.bf16 %v484_v53, %v484_v53  ;;  %v485_v61 = vmax.f32 %v481_v54, 0.0  ;;  %v461_v62 = vadd.f32 %v460_v57, %v411_v58 }
  0xea   : > { %493 = vst.msk [vmem:[%s837_s18 + $0x4] sm:$0xf] %vm491_vm2, %v488_v56  ;;  %v489_v63 = vpack.c.bf16 %v485_v61, %v485_v61  ;;  %v470_v2 = vmax.f32 %v451_v60, %v461_v62 }
  0xec   : > { %494 = vst.msk [vmem:[%s837_s18 + $0x8] sm:$0xf] %vm491_vm2, %v489_v63  ;;  %v474_v3 = vmax.f32 %v466_v0, %v470_v2 }
  0xee   : > { %v482_v4 = vadd.f32 %v715_v27, %v474_v3 }
  0xf0   : > { %v486_v5 = vmax.f32 %v482_v4, 0.0 }
  0xf2   : > { %v490_v6 = vpack.c.bf16 %v486_v5, %v486_v5 }
  0xf4   : > { %495 = vst.msk [vmem:[%s837_s18 + $0xc] sm:$0xf] %vm491_vm2, %v490_v6 }
  0xf5 PF: > { %s13_s12 = sadd.s32 1, %s722_s12  }
  0xf6   : > { %p10_p4 = scmp.ge.s32.totalorder %s13_s12, 4  }
  0xf8   :  { %12 = sbr.rel (!%p10_p4) target bundleno = 1 (0x1), region = 62 }

// kernel: net_forward.5
= control target key start
LH: loop header
LB: loop body
LE: loop exit
PB: predicated region body
PF: predicated region fallthrough
CT: control target
= control target key end

     0   :  { %s895_s0 = inlined_call_operand.vmem [shape: bf16[2,400], index: 0, kind: input, shape index: {}]   ;;  %s896_s1 = inlined_call_operand.vmem [shape: bf16[400,128], index: 1, kind: input, shape index: {}]   ;;  %s897_s2 = inlined_call_operand.vmem [shape: f32[1,128], index: 2, kind: input, shape index: {}]   ;;  %s898_s3 = inlined_call_operand.vmem [shape: bf16[128,128], index: 3, kind: input, shape index: {}]   ;;  %s899_s4 = inlined_call_operand.vmem [shape: f32[1,128], index: 4, kind: input, shape index: {}]   ;;  %s900_s5 = inlined_call_operand.vmem [shape: bf16[128,128], index: 5, kind: input, shape index: {}]   ;;  %s901_s6 = inlined_call_operand.vmem [shape: f32[1,128], index: 6, kind: input, shape index: {}]   ;;  %s902_s7 = inlined_call_operand.hbm [shape: f32[2,128], index: 7, kind: output, shape index: {}]  }
   0x1   :  { %v652_v0 = vld [vmem:[%s896_s1 + $0x38] sm:$0xff]  ;;  %v651_v3 = vld [vmem:[%s896_s1 + $0x30] sm:$0xff]  ;;  %v650_v6 = vld [vmem:[%s896_s1 + $0x28] sm:$0xff] }
   0x2   :  { %v660_v1 = vld [vmem:[%s896_s1 + $0x78] sm:$0xff]  ;;  %245 = vmatpush.bf16.msra.mxu0 %v652_v0  ;;  %v659_v4 = vld [vmem:[%s896_s1 + $0x70] sm:$0xff]  ;;  %v658_v7 = vld [vmem:[%s896_s1 + $0x68] sm:$0xff] }
   0x3   :  { %v668_v2 = vld [vmem:[%s896_s1 + $0xb8] sm:$0xff]  ;;  %258 = vmatpush.bf16.msra.mxu1 %v660_v1  ;;  %v667_v5 = vld [vmem:[%s896_s1 + $0xb0] sm:$0xff]  ;;  %v669_v8 = vld [vmem:[%s896_s1 + $0xc0] sm:$0xff] }
   0x4   :  { %271 = vmatpush.bf16.msra.mxu2 %v668_v2  ;;  %v666_v9 = vld [vmem:[%s896_s1 + $0xa8] sm:$0xff]  ;;  %v28_v10 = vld [vmem:[%s895_s0] sm:$0xf]  ;;  %291 = vmatpush.bf16.msra.mxu3 %v669_v8  ;;  %v677_v11 = vld [vmem:[%s898_s3 + $0x38] sm:$0xff] }
   0x5   :  { %84 = vst [vmem:[#allocation1] ss:$9 sm:$0xff] %v28_v10  ;;  %v649_v12 = vld [vmem:[%s896_s1 + $0x20] sm:$0xff]  ;;  %v676_v15 = vld [vmem:[%s898_s3 + $0x30] sm:$0xff] }
   0x6   :  { %246 = vmatpush.bf16.msra.mxu0 %v651_v3  ;;  %v657_v13 = vld [vmem:[%s896_s1 + $0x60] sm:$0xff] }
   0x7   :  { %259 = vmatpush.bf16.msra.mxu1 %v659_v4  ;;  %v665_v14 = vld [vmem:[%s896_s1 + $0xa0] sm:$0xff] }
   0x8   :  { %272 = vmatpush.bf16.msra.mxu2 %v667_v5  ;;  %367 = vmatpush.bf16.msrb.mxu3 %v677_v11 }
   0xa   :  { %247 = vmatpush.bf16.msra.mxu0 %v650_v6 }
   0xb   :  { %260 = vmatpush.bf16.msra.mxu1 %v658_v7 }
   0xc   :  { %273 = vmatpush.bf16.msra.mxu2 %v666_v9 }
   0xd   :  { %12 = vsyncpa [#allocation3], 0  ;;  %vm242_vm0 = vcmask 130048   ;;  %v648_v16 = vld [vmem:[%s896_s1 + $0x18] sm:$0xff]  ;;  %368 = vmatpush.bf16.msrb.mxu3 %v676_v15  ;;  %v675_v20 = vld [vmem:[%s898_s3 + $0x28] sm:$0xff]  ;;  %s716_s16 = smov [#allocation2]  }
   0xe   :  { %248 = vmatpush.bf16.msra.mxu0 %v649_v12  ;;  %v656_v17 = vld [vmem:[%s896_s1 + $0x58] sm:$0xff]  ;;  %v647_v21 = vld [vmem:[%s896_s1 + $0x10] sm:$0xff]  ;;  %v674_v24 = vld [vmem:[%s898_s3 + $0x20] sm:$0xff] }
   0xf   :  { %261 = vmatpush.bf16.msra.mxu1 %v657_v13  ;;  %v664_v18 = vld [vmem:[%s896_s1 + $0x98] sm:$0xff]  ;;  %v655_v22 = vld [vmem:[%s896_s1 + $0x50] sm:$0xff]  ;;  %v646_v25 = vld [vmem:[%s896_s1 + $0x8] sm:$0xff] }
  0x10   :  { %274 = vmatpush.bf16.msra.mxu2 %v665_v14  ;;  %v88_v19 = vld [vmem:[#allocation1 + $0x1b] sm:$0xff]  ;;  %v663_v23 = vld [vmem:[%s896_s1 + $0x90] sm:$0xff]  ;;  %v654_v26 = vld [vmem:[%s896_s1 + $0x48] sm:$0xff] }
  0x11   :  { %580 = vmatmul.msk.bf16.vlgmr.msra.gmra.mxu3 %vm242_vm0, %v88_v19  ;;  %v662_v27 = vld [vmem:[%s896_s1 + $0x88] sm:$0xff]  ;;  %v645_v28 = vld [vmem:[%s896_s1] sm:$0xff]  ;;  %v87_v33 = vld [vmem:[#allocation1 + $0x12] sm:$0xff] }
  0x12   :  { %249 = vmatpush.bf16.msra.mxu0 %v648_v16  ;;  %369 = vmatpush.bf16.msrb.mxu3 %v675_v20  ;;  %v653_v29 = vld [vmem:[%s896_s1 + $0x40] sm:$0xff]  ;;  %v86_v32 = vld [vmem:[#allocation1 + $0x9] sm:$0xff]  ;;  %v673_v34 = vld [vmem:[%s898_s3 + $0x18] sm:$0xff] }
  0x13   :  { %262 = vmatpush.bf16.msra.mxu1 %v656_v17  ;;  %v661_v30 = vld [vmem:[%s896_s1 + $0x80] sm:$0xff]  ;;  %v672_v35 = vld [vmem:[%s898_s3 + $0x10] sm:$0xff]  ;;  %v671_v36 = vld [vmem:[%s898_s3 + $0x8] sm:$0xff]  ;;  %s469_s1 = sshll.u32 %s716_s16, 4  ;;  %s470_s1 = int_to_ptr.vmem [resolvable:$true] %s469_s1 }
  0x14   :  { %275 = vmatpush.bf16.msra.mxu2 %v664_v18  ;;  %v85_v31 = vld [vmem:[#allocation1] sm:$0xff]  ;;  %v685_v38 = vld [vmem:[%s900_s5 + $0x38] sm:$0xff]  ;;  %v684_v39 = vld [vmem:[%s900_s5 + $0x30] sm:$0xff] }
  0x15   :  { %v670_v37 = vld [vmem:[%s898_s3] sm:$0xff]  ;;  %v683_v41 = vld [vmem:[%s900_s5 + $0x28] sm:$0xff]  ;;  %v681_v45 = vld [vmem:[%s900_s5 + $0x18] sm:$0xff] }
  0x16   :  { %250 = vmatpush.bf16.msra.mxu0 %v647_v21  ;;  %370 = vmatpush.bf16.msrb.mxu3 %v674_v24  ;;  %v682_v42 = vld [vmem:[%s900_s5 + $0x20] sm:$0xff]  ;;  %v680_v49 = vld [vmem:[%s900_s5 + $0x10] sm:$0xff]  ;;  %v679_v59 = vld [vmem:[%s900_s5 + $0x8] sm:$0xff] }
  0x17   :  { %263 = vmatpush.bf16.msra.mxu1 %v655_v22  ;;  %v687_v43 = vld [vmem:[%s897_s2] ss:$0 sm:$0xff] }
  0x18   :  { %276 = vmatpush.bf16.msra.mxu2 %v663_v23  ;;  %v678_v60 = vld [vmem:[%s900_s5] sm:$0xff]  ;;  %s471_s5 = sshll.u32 %s902_s7, 4  ;;  %s472_s5 = int_to_ptr.hbm [resolvable:$true] %s471_s5 }
  0x19   :  { %v688_v61 = vld [vmem:[%s899_s4] ss:$0 sm:$0xff] }
  0x1a   :  { %251 = vmatpush.bf16.msra.mxu0 %v646_v25  ;;  %371 = vmatpush.bf16.msrb.mxu3 %v673_v34  ;;  %v689_v3 = vld [vmem:[%s901_s6] ss:$0 sm:$0xff] }
  0x1b   :  { %264 = vmatpush.bf16.msra.mxu1 %v654_v26 }
  0x1c   :  { %277 = vmatpush.bf16.msra.mxu2 %v662_v27 }
  0x1e   :  { %252 = vmatpush.bf16.msra.mxu0 %v645_v28  ;;  %372 = vmatpush.bf16.msrb.mxu3 %v672_v35 }
  0x1f   :  { %265 = vmatpush.bf16.msra.mxu1 %v653_v29 }
  0x20   :  { %278 = vmatpush.bf16.msra.mxu2 %v661_v30 }
  0x21   :  { %253 = vmatmul.bf16.vlgmr.msra.gmra.mxu0 %v85_v31 }
  0x22   :  { %266 = vmatmul.bf16.vlgmr.msra.gmra.mxu1 %v86_v32  ;;  %373 = vmatpush.bf16.msrb.mxu3 %v671_v36 }
  0x23   :  { %279 = vmatmul.bf16.vlgmr.msra.gmra.mxu2 %v87_v33  ;;  %450 = vmatpush.bf16.msrb.mxu0 %v685_v38 }
  0x26   :  { %374 = vmatpush.bf16.msrb.mxu3 %v670_v37 }
  0x27   :  { %451 = vmatpush.bf16.msrb.mxu0 %v684_v39 }
  0x2b   :  { %452 = vmatpush.bf16.msrb.mxu0 %v683_v41 }
  0x2f   :  { %453 = vmatpush.bf16.msrb.mxu0 %v682_v42 }
  0x33   :  { %454 = vmatpush.bf16.msrb.mxu0 %v681_v45 }
  0x37   :  { %455 = vmatpush.bf16.msrb.mxu0 %v680_v49 }
  0x3b   :  { %456 = vmatpush.bf16.msrb.mxu0 %v679_v59 }
  0x3f   :  { %457 = vmatpush.bf16.msrb.mxu0 %v678_v60 }
  0x94   :  { %v293_v40 = vpop.f32.mrf.mxu3 }
  0x9c   :  { %v295_v44 = vpop.f32.mrf.mxu3 }
  0x9e   :  { %v254_v46 = vpop.f32.mrf.mxu0 }
  0x9f   :  { %v267_v47 = vpop.f32.mrf.mxu1  ;;  %v255_v48 = vadd.f32 %v687_v43, %v254_v46 }
  0xa1   :  { %v268_v50 = vadd.f32 %v267_v47, %v255_v48 }
  0xa6   :  { %v280_v51 = vpop.f32.mrf.mxu2  ;;  %v256_v53 = vpop.f32.mrf.mxu0 }
  0xa7   :  { %v281_v52 = vadd.f32 %v280_v51, %v268_v50  ;;  %v269_v54 = vpop.f32.mrf.mxu1 }
  0xa9   :  { %v294_v55 = vadd.f32 %v293_v40, %v281_v52 }
  0xab   :  { %v297_v56 = vmax.f32 %v294_v55, 0.0 }
  0xad   :  { %v298_v57 = vpack.c.bf16 %v297_v56, %v297_v56 }
  0xae   :  { %v282_v58 = vpop.f32.mrf.mxu2 }
  0xaf   :  { %375 = vmatmul.bf16.vlgmr.msrb.gmra.mxu3 %v298_v57 }
 0x132   :  { %v376_v62 = vpop.f32.mrf.mxu3 }
 0x133   :  { %v377_v63 = vadd.f32 %v688_v61, %v376_v62 }
 0x135   :  { %v380_v0 = vmax.f32 %v377_v63, 0.0 }
 0x137   :  { %v381_v1 = vpack.c.bf16 %v380_v0, %v380_v0 }
 0x139   :  { %458 = vmatmul.bf16.vlgmr.msrb.gmra.mxu0 %v381_v1 }
 0x13a   :  { %v378_v2 = vpop.f32.mrf.mxu3 }
 0x1b6   :  { %v459_v4 = vpop.f32.mrf.mxu0 }
 0x1b7   :  { %v460_v5 = vadd.f32 %v689_v3, %v459_v4 }
 0x1b9   :  { %463 = vst [vmem:[#allocation2] sm:$0x3] %v460_v5 }
 0x1ba   :  { %474 = dma.vmem_to_hbm [thread:$0]  %s470_s1, 32, %s472_s5, [#allocation3]  }
 0x1be   :  { %v461_v6 = vpop.f32.mrf.mxu0 }
 0x1bf   :  { %714 = dma.done.wait [#allocation3], 32  }
 0x1c0   :  { %715 = vsyncadd [#allocation3], 4294967264 }
 0x1c1   :  { %479 = vsyncpa [#allocation3], 1 }

</bundles_post_ra>
